<compile_context>
chip_gen: v7x
topology: tpu7x:2x2x1
jax: 0.10.0
libtpu: 0.0.40
codegen_flags: <defaults>
</compile_context>

<pallas_src>
import functools
import math

import jax
import jax.numpy as jnp
from jax.experimental import pallas as pl
from jax.experimental.pallas import tpu as pltpu


def _bottleneck_kernel(sc_ref, x_ref, w1_ref, w2_ref, w3_ref, c1_ref, c3_ref,
                       out_ref, *scratch, fuse_taps, B, H, W):
    """Fixup Bottleneck forward for a fold of B images (pixels flattened to rows).

    sc_ref : SMEM f32[2]              -> [b2, b3] (the only non-folded scalar biases)
    x_ref  : VMEM (M, Cin)   bf16     -> M = B*H*W pixels of the fold
    w1_ref : VMEM (Cin, P)   bf16     -> conv1 1x1 weight
    w2_ref : VMEM (9P, P) or (9,P,P) bf16 -> conv2 3x3 weight (im2col layout if fuse_taps)
    w3_ref : VMEM (P, Cout)  bf16     -> conv3 1x1 weight, multiplicator pre-folded
    c1_ref : VMEM (1, P)     f32      -> folded bias: b0*sum_in(w1) + b1
    c3_ref : VMEM (1, Cout)  f32      -> folded bias: mult*b4*sum_in(w3) + b5
    out_ref: VMEM (M, Cout)  out_dtype
    scratch: pad_ref VMEM (B, H+2, W, P) f32  [+ slab_ref VMEM (M, 9P) bf16 if fuse_taps]
    """
    M, _Cin = x_ref.shape
    P = w1_ref.shape[1]

    pad_ref = scratch[0]
    slab_ref = scratch[1] if fuse_taps else None

    b2 = sc_ref[0]
    b3 = sc_ref[1]

    # ---- conv1: 1x1 conv == channel matmul over all pixels (bf16 MXU, f32 acc). ----
    h1 = jnp.dot(x_ref[...], w1_ref[...], preferred_element_type=jnp.float32)   # (M, P)
    r1 = (jnp.maximum(h1 + c1_ref[...], 0.0) + b2).reshape(B, H, W, P)          # f32

    # ---- conv2: 3x3, stride=1, pad=1 ----
    # H padding via a persistent VMEM scratch; border rows are re-zeroed every step
    # (cheap, and megacore-safe since scratch is per-core).
    zrow = jnp.zeros((B, 1, W, P), jnp.float32)
    pad_ref[:, 0:1] = zrow
    pad_ref[:, H + 1:H + 2] = zrow
    pad_ref[:, 1:H + 1] = r1

    # Edge masks hoisted out of the tap loop; iota built at minimal shape.
    col = jax.lax.broadcasted_iota(jnp.int32, (1, 1, W, 1), 2)
    mask_l = jnp.broadcast_to(col >= 1, (B, H, W, P))
    mask_r = jnp.broadcast_to(col <= W - 2, (B, H, W, P))

    acc = None
    for kh in range(3):
        row = pad_ref[:, kh:kh + H]                                    # (B, H, W, P) f32
        for kw in range(3):
            if kw == 1:
                tap = row
            elif kw == 0:   # needs column x-1 -> zero the wrapped first column
                tap = jnp.where(mask_l, pltpu.roll(row, shift=1, axis=2), 0.0)
            else:           # kw == 2: needs column x+1 -> zero the wrapped last column
                tap = jnp.where(mask_r, pltpu.roll(row, shift=W - 1, axis=2), 0.0)
            tap = tap.reshape(M, P).astype(jnp.bfloat16)
            t = kh * 3 + kw
            if fuse_taps:
                slab_ref[:, t * P:(t + 1) * P] = tap
            else:
                d = jnp.dot(tap, w2_ref[t], preferred_element_type=jnp.float32)
                acc = d if acc is None else acc + d

    if fuse_taps:
        # im2col: one (M, 9P) x (9P, P) matmul -> the MXU accumulates the 9 taps.
        h2 = jnp.dot(slab_ref[...], w2_ref[...], preferred_element_type=jnp.float32)
    else:
        h2 = acc
    r2 = jnp.maximum(h2 + b3, 0.0).astype(jnp.bfloat16)                # b4 folded into c3

    # ---- conv3: 1x1 conv (multiplicator folded into w3) + identity residual + relu ----
    h3 = jnp.dot(r2, w3_ref[...], preferred_element_type=jnp.float32)  # (M, Cout)
    xres = x_ref[...].astype(jnp.float32)                              # bf16-quantized skip
    out = jnp.maximum(h3 + c3_ref[...] + xres, 0.0)
    out_ref[...] = out.astype(out_ref.dtype)


def _device_kind():
    try:
        return jax.devices()[0].device_kind.lower()
    except Exception:
        return ""


def _vmem_capacity_bytes():
    try:
        cap = getattr(pltpu.get_tpu_info(), "vmem_capacity_bytes", None)
        if cap:
            return int(cap)
    except Exception:
        pass
    return 64 * 1024 * 1024   # conservative default (v7x per-core VMEM)


def _fuse_tap_threshold():
    # v6e/v7x MXUs are 256 deep -> per-tap contraction K=P<256 underfills them; v5e's
    # 128-deep MXU is already full at P=128.
    return 128 if "v5" in _device_kind() else 256


def bottleneck_forward_nhwc(x_nhwc, w1_oihw, w2_oihw, w3_oihw, biases,
                            multiplicator, out_dtype=jnp.bfloat16):
    """Fixup Bottleneck forward (stride=1, downsample=None), NHWC in / NHWC out.

    x_nhwc : (N, H, W, Cin) -- Cin must equal 4*planes (identity residual); cast to bf16.
    w*_oihw: PyTorch-layout conv weights (O, I, kh, kw).
    biases : (6,) f32 fixup biases; multiplicator: scalar f32.
    Returns (N, H, W, Cout) in `out_dtype` (bf16 by default -- next block consumes bf16).
    """
    # TODO(synk): stride>1 and the optional `downsample` 1x1-conv branch are not
    #             implemented (the stride=1 / downsample=None configuration is covered).
    # TODO(synk): very large feature maps (112x112) would want an extra H-tiled grid axis
    #             with a 1-row halo; W not a multiple of the sublane tile incurs relayouts.
    N, H, W, Cin = x_nhwc.shape
    P = w1_oihw.shape[0]
    Cout = w3_oihw.shape[0]
    assert Cout == Cin, "identity residual requires inplanes == planes * expansion"

    b = jnp.asarray(biases, jnp.float32).reshape(6)
    mult = jnp.asarray(multiplicator, jnp.float32).reshape(())

    w1_f = jnp.asarray(w1_oihw, jnp.float32)[:, :, 0, 0].T                  # (Cin, P)
    w2_f = jnp.transpose(jnp.asarray(w2_oihw, jnp.float32),
                         (2, 3, 1, 0)).reshape(9, P, P)                     # (tap, in, out)
    w3_f = jnp.asarray(w3_oihw, jnp.float32)[:, :, 0, 0].T                  # (P, Cout)

    # Fold 1x1-conv scalar pre-biases into per-channel post-matmul biases and the fixup
    # multiplicator into the conv3 weight (exact for 1x1 convs; b2 is kept as a scalar
    # add because conv2 zero-pads its input).
    c1 = (b[0] * jnp.sum(w1_f, axis=0) + b[1]).reshape(1, P)
    c3 = (mult * b[4] * jnp.sum(w3_f, axis=0) + b[5]).reshape(1, Cout)
    w1 = w1_f.astype(jnp.bfloat16)
    w3 = (mult * w3_f).astype(jnp.bfloat16)
    scalars = jnp.stack([b[2], b[3]])                                       # SMEM scalars

    fuse_taps = P < _fuse_tap_threshold()
    if fuse_taps:
        w2 = w2_f.reshape(9 * P, P).astype(jnp.bfloat16)                    # im2col layout
        w2_shape, w2_idx = (9 * P, P), (lambda n, sc: (0, 0))
    else:
        w2 = w2_f.astype(jnp.bfloat16)
        w2_shape, w2_idx = (9, P, P), (lambda n, sc: (0, 0, 0))

    # Pixels flattened to rows: free metadata reshape outside the kernel, keeps all
    # in-kernel reshapes in the cheap "split/merge leading dims of an f32 value" class.
    x = x_nhwc.astype(jnp.bfloat16).reshape(N * H * W, Cin)
    out_bytes = jnp.dtype(out_dtype).itemsize

    # --- batch folding: biggest fold that fits a VMEM budget, capped at N//2 so the grid
    #     always has >= 2 steps (v7x megacore + DMA pipelining). ---
    HW = H * W
    vmem_cap = _vmem_capacity_bytes()
    weight_bytes = 2 * (w1.size + w2.size + w3.size) + 4 * (c1.size + c3.size)
    per_pixel = (2 * 2 * Cin             # input block (bf16, double buffered)
                 + 2 * out_bytes * Cout  # output block (double buffered)
                 + 2 * 9 * P             # bf16 im2col slab scratch
                 + 4 * 2 * P             # f32 H-padded scratch + r1
                 + 4 * (P + Cout))       # f32 accumulator / temporary headroom
    budget = int(0.55 * vmem_cap) - 2 * weight_bytes
    m_cap = min(8192, max(HW, budget // max(per_pixel, 1)))
    max_fold = max(1, N // 2)
    B = 1
    for cand in range(1, max_fold + 1):
        if N % cand == 0 and cand * HW <= m_cap:
            B = cand
    M = B * HW

    flops = 2 * N * HW * (Cin * P + 9 * P * P + P * Cout)
    bytes_accessed = (x.size + w1.size + w2.size + w3.size) * 2 \
        + (c1.size + c3.size) * 4 + N * HW * Cout * out_bytes

    scratch_shapes = [pltpu.VMEM((B, H + 2, W, P), jnp.float32)]
    if fuse_taps:
        scratch_shapes.append(pltpu.VMEM((M, 9 * P), jnp.bfloat16))

    # TODO(synk): for Cout < 128 a lane-packed (B, H, W*Cout) output block would avoid
    #             masked vst writeback; real bottlenecks have Cout = 4*planes >= 256
    #             (already lane-dense), so the natural channel-minor layout is kept.
    def build(weight_pipeline_mode):
        extra = ({} if weight_pipeline_mode is None
                 else {"pipeline_mode": weight_pipeline_mode})
        in_specs = [
            pl.BlockSpec((M, Cin), lambda n, sc: (n, 0)),
            pl.BlockSpec((Cin, P), lambda n, sc: (0, 0), **extra),
            pl.BlockSpec(w2_shape, w2_idx, **extra),
            pl.BlockSpec((P, Cout), lambda n, sc: (0, 0), **extra),
            pl.BlockSpec((1, P), lambda n, sc: (0, 0), **extra),
            pl.BlockSpec((1, Cout), lambda n, sc: (0, 0), **extra),
        ]
        return pl.pallas_call(
            functools.partial(_bottleneck_kernel, fuse_taps=fuse_taps, B=B, H=H, W=W),
            out_shape=jax.ShapeDtypeStruct((N * HW, Cout), out_dtype),
            grid_spec=pltpu.PrefetchScalarGridSpec(
                num_scalar_prefetch=1,                 # b2, b3 -> SMEM
                grid=(N // B,),
                in_specs=in_specs,
                out_specs=pl.BlockSpec((M, Cout), lambda n, sc: (n, 0)),
                scratch_shapes=scratch_shapes,
            ),
            compiler_params=pltpu.CompilerParams(
                dimension_semantics=("parallel",),     # batch-fold axis -> both v7x TCs
                vmem_limit_bytes=max(32 * 1024 * 1024,
                                     min(int(0.7 * vmem_cap), 96 * 1024 * 1024)),
            ),
            cost_estimate=pl.CostEstimate(
                flops=flops, transcendentals=0, bytes_accessed=bytes_accessed),
        )

    args = (scalars, x, w1, w2, w3, c1, c3)
    try:
        # Invariant weights/biases: single buffering halves their VMEM footprint.
        out_flat = build(pl.Buffered(1))(*args)
    except Exception:
        out_flat = build(None)(*args)

    return out_flat.reshape(N, H, W, Cout)


def bottleneck_forward(x_nchw, w1_oihw, w2_oihw, w3_oihw, biases, multiplicator,
                       out_dtype=jnp.bfloat16):
    """NCHW-in / NCHW-out convenience wrapper.  Use only at the network boundary --
    between blocks, chain `bottleneck_forward_nhwc` directly to avoid the transposes."""
    x = jnp.transpose(x_nchw, (0, 2, 3, 1))
    y = bottleneck_forward_nhwc(x, w1_oihw, w2_oihw, w3_oihw, biases, multiplicator,
                                out_dtype=out_dtype)
    return jnp.transpose(y, (0, 3, 1, 2))


if __name__ == "__main__":
    # Small shapes consistent with the module: planes=8, inplanes=4*planes=32, 8x8 spatial.
    N, H, W = 2, 8, 8
    planes = 8
    inplanes = planes * 4
    fixup_l = 4
    m = 3

    key = jax.random.PRNGKey(0)
    k_x, k_w1, k_w2, k_w3, k_b = jax.random.split(key, 5)

    x_nchw = jax.random.normal(k_x, (N, inplanes, H, W), jnp.float32)

    # Fixup-style init (same std formulas as the module's __init__).
    std1 = fixup_l ** (-1.0 / (2 * m - 2)) * math.sqrt(2.0 / (1 * 1 * planes))
    std2 = fixup_l ** (-1.0 / (2 * m - 2)) * math.sqrt(2.0 / (3 * 3 * planes))
    w1 = std1 * jax.random.normal(k_w1, (planes, inplanes, 1, 1), jnp.float32)
    w2 = std2 * jax.random.normal(k_w2, (planes, planes, 3, 3), jnp.float32)
    # NOTE: the module zero-initializes conv3.weight; small random values exercise the
    # full conv3 / multiplicator / bias path numerically.
    w3 = 0.05 * jax.random.normal(k_w3, (planes * 4, planes, 1, 1), jnp.float32)
    biases = 0.1 * jax.random.normal(k_b, (6,), jnp.float32)
    multiplicator = jnp.float32(1.25)

    # Network-boundary layout conversion (done once); between blocks the NHWC bf16 output
    # of one call feeds the next call directly (no transposes).
    x_nhwc = jnp.transpose(x_nchw, (0, 2, 3, 1))
    out_nhwc = bottleneck_forward_nhwc(x_nhwc, w1, w2, w3, biases, multiplicator)
    out_nhwc = jax.block_until_ready(out_nhwc)
    assert out_nhwc.shape == (N, H, W, inplanes)
    assert out_nhwc.dtype == jnp.bfloat16

    out = jnp.transpose(out_nhwc.astype(jnp.float32), (0, 3, 1, 2))

    # Pure-JAX reference (same math, NCHW, f32) to validate the kernel.
    def conv(x_, w_, stride=1, pad=0):
        return jax.lax.conv_general_dilated(
            x_, w_, (stride, stride), [(pad, pad), (pad, pad)],
            dimension_numbers=("NCHW", "OIHW", "NCHW"),
            precision=jax.lax.Precision.HIGHEST)

    b = biases
    r = conv(x_nchw + b[0], w1)
    r = jnp.maximum(r + b[1], 0.0)
    r = conv(r + b[2], w2, pad=1)
    r = jnp.maximum(r + b[3], 0.0)
    r = multiplicator * conv(r + b[4], w3) + b[5]
    r = jnp.maximum(r + x_nchw, 0.0)

    err = float(jnp.max(jnp.abs(out - r)))
    scale = float(jnp.max(jnp.abs(r)))
    # bf16 MXU matmuls + bf16 activations/output -> looser tolerance than pure f32.
    assert err <= 3e-2 * max(scale, 1.0) + 3e-2, f"mismatch vs reference: {err} (scale {scale})"
    print("KERNEL_OK")
</pallas_src>

<mosaic_0001>
module attributes {stable_mosaic.version = 11 : i64} {
  func.func @_bottleneck_kernel(%arg0: i32, %arg1: memref<2xf32, #tpu.memory_space<smem>>, %arg2: memref<64x32xbf16, #tpu.memory_space<vmem>>, %arg3: memref<32x8xbf16, #tpu.memory_space<vmem>>, %arg4: memref<72x8xbf16, #tpu.memory_space<vmem>>, %arg5: memref<8x32xbf16, #tpu.memory_space<vmem>>, %arg6: memref<1x8xf32, #tpu.memory_space<vmem>>, %arg7: memref<1x32xf32, #tpu.memory_space<vmem>>, %arg8: memref<64x32xbf16, #tpu.memory_space<vmem>>, %arg9: memref<1x10x8x8xf32, #tpu.memory_space<vmem>>, %arg10: memref<64x72xbf16, #tpu.memory_space<vmem>>) attributes {dimension_semantics = [#tpu.dimension_semantics<parallel>], iteration_bounds = array<i64: 2>, scalar_prefetch = 1 : i64, scratch_operands = 2 : i64, tpu.core_type = #tpu.core_type<tc>, window_params = [{transform_indices = @transform_0, window_bounds = array<i64: 64, 32>}, {pipeline_mode = #tpu.pipeline_mode<synchronous>, transform_indices = @transform_1, window_bounds = array<i64: 32, 8>}, {pipeline_mode = #tpu.pipeline_mode<synchronous>, transform_indices = @transform_2, window_bounds = array<i64: 72, 8>}, {pipeline_mode = #tpu.pipeline_mode<synchronous>, transform_indices = @transform_3, window_bounds = array<i64: 8, 32>}, {pipeline_mode = #tpu.pipeline_mode<synchronous>, transform_indices = @transform_4, window_bounds = array<i64: 1, 8>}, {pipeline_mode = #tpu.pipeline_mode<synchronous>, transform_indices = @transform_5, window_bounds = array<i64: 1, 32>}, {transform_indices = @transform_6, window_bounds = array<i64: 64, 32>}]} {
    %c0 = arith.constant 0 : index
    %0 = memref.load %arg1[%c0] : memref<2xf32, #tpu.memory_space<smem>>
    %c1 = arith.constant 1 : index
    %1 = memref.load %arg1[%c1] : memref<2xf32, #tpu.memory_space<smem>>
    %c0_0 = arith.constant 0 : index
    %c0_1 = arith.constant 0 : index
    %2 = vector.load %arg2[%c0_0, %c0_1] : memref<64x32xbf16, #tpu.memory_space<vmem>>, vector<64x32xbf16>
    %c0_2 = arith.constant 0 : index
    %c0_3 = arith.constant 0 : index
    %3 = vector.load %arg3[%c0_2, %c0_3] : memref<32x8xbf16, #tpu.memory_space<vmem>>, vector<32x8xbf16>
    %cst = arith.constant dense<0.000000e+00> : vector<64x8xf32>
    %4 = tpu.matmul %2, %3, %cst {dimension_numbers = #tpu.dot_dimension_numbers<[1], [0], [0], [1], [0, 0, 1, 1], [], []>} : vector<64x32xbf16>, vector<32x8xbf16>, vector<64x8xf32> -> vector<64x8xf32>
    %c0_4 = arith.constant 0 : index
    %c0_5 = arith.constant 0 : index
    %5 = vector.load %arg6[%c0_4, %c0_5] : memref<1x8xf32, #tpu.memory_space<vmem>>, vector<1x8xf32>
    %6 = vector.broadcast %5 : vector<1x8xf32> to vector<64x8xf32>
    %7 = arith.addf %4, %6 : vector<64x8xf32>
    %cst_6 = arith.constant 0.000000e+00 : f32
    %8 = vector.broadcast %cst_6 : f32 to vector<64x8xf32>
    %9 = arith.maximumf %7, %8 : vector<64x8xf32>
    %10 = vector.broadcast %0 : f32 to vector<64x8xf32>
    %11 = arith.addf %9, %10 : vector<64x8xf32>
    %12 = vector.shape_cast %11 : vector<64x8xf32> to vector<1x8x8x8xf32>
    %cst_7 = arith.constant 0.000000e+00 : f32
    %13 = vector.broadcast %cst_7 : f32 to vector<1x1x8x8xf32>
    %c0_8 = arith.constant 0 : index
    %c0_9 = arith.constant 0 : index
    %c0_10 = arith.constant 0 : index
    %c0_11 = arith.constant 0 : index
    %14 = vector.load %arg9[%c0_8, %c0_9, %c0_10, %c0_11] : memref<1x10x8x8xf32, #tpu.memory_space<vmem>>, vector<1x1x8x8xf32>
    tpu.vector_store %arg9[%c0_8, %c0_9, %c0_10, %c0_11], %13 {strides = array<i32>} : memref<1x10x8x8xf32, #tpu.memory_space<vmem>>, vector<1x1x8x8xf32>,
    %c0_12 = arith.constant 0 : index
    %c9 = arith.constant 9 : index
    %c0_13 = arith.constant 0 : index
    %c0_14 = arith.constant 0 : index
    %15 = vector.load %arg9[%c0_12, %c9, %c0_13, %c0_14] : memref<1x10x8x8xf32, #tpu.memory_space<vmem>>, vector<1x1x8x8xf32>
    tpu.vector_store %arg9[%c0_12, %c9, %c0_13, %c0_14], %13 {strides = array<i32>} : memref<1x10x8x8xf32, #tpu.memory_space<vmem>>, vector<1x1x8x8xf32>,
    %c0_15 = arith.constant 0 : index
    %c1_16 = arith.constant 1 : index
    %c0_17 = arith.constant 0 : index
    %c0_18 = arith.constant 0 : index
    %16 = vector.load %arg9[%c0_15, %c1_16, %c0_17, %c0_18] : memref<1x10x8x8xf32, #tpu.memory_space<vmem>>, vector<1x8x8x8xf32>
    tpu.vector_store %arg9[%c0_15, %c1_16, %c0_17, %c0_18], %12 {strides = array<i32>} : memref<1x10x8x8xf32, #tpu.memory_space<vmem>>, vector<1x8x8x8xf32>,
    %17 = tpu.iota {dimensions = array<i32: 2>} : vector<1x1x8x1xi32>
    %c1_i32 = arith.constant 1 : i32
    %18 = vector.broadcast %c1_i32 : i32 to vector<1x1x8x1xi32>
    %19 = arith.cmpi sge, %17, %18 : vector<1x1x8x1xi32>
    %20 = vector.shape_cast %19 : vector<1x1x8x1xi1> to vector<1x1x8x1xi1>
    %21 = vector.broadcast %20 : vector<1x1x8x1xi1> to vector<1x8x8x8xi1>
    %c6_i32 = arith.constant 6 : i32
    %22 = vector.broadcast %c6_i32 : i32 to vector<1x1x8x1xi32>
    %23 = arith.cmpi sle, %17, %22 : vector<1x1x8x1xi32>
    %24 = vector.shape_cast %23 : vector<1x1x8x1xi1> to vector<1x1x8x1xi1>
    %25 = vector.broadcast %24 : vector<1x1x8x1xi1> to vector<1x8x8x8xi1>
    %c0_19 = arith.constant 0 : index
    %c0_20 = arith.constant 0 : index
    %c0_21 = arith.constant 0 : index
    %c0_22 = arith.constant 0 : index
    %26 = vector.load %arg9[%c0_19, %c0_20, %c0_21, %c0_22] : memref<1x10x8x8xf32, #tpu.memory_space<vmem>>, vector<1x8x8x8xf32>
    %c1_i32_23 = arith.constant 1 : i32
    %27 = tpu.dynamic_rotate %26 by %c1_i32_23 dim 2 : vector<1x8x8x8xf32>, i32 -> vector<1x8x8x8xf32>
    %cst_24 = arith.constant 0.000000e+00 : f32
    %28 = vector.broadcast %cst_24 : f32 to vector<1x8x8x8xf32>
    %29 = arith.select %21, %27, %28 : vector<1x8x8x8xi1>, vector<1x8x8x8xf32>
    %30 = vector.shape_cast %29 : vector<1x8x8x8xf32> to vector<64x8xf32>
    %31 = arith.truncf %30 : vector<64x8xf32> to vector<64x8xbf16>
    %c0_25 = arith.constant 0 : index
    %c0_26 = arith.constant 0 : index
    %32 = vector.load %arg10[%c0_25, %c0_26] : memref<64x72xbf16, #tpu.memory_space<vmem>>, vector<64x8xbf16>
    tpu.vector_store %arg10[%c0_25, %c0_26], %31 {strides = array<i32>} : memref<64x72xbf16, #tpu.memory_space<vmem>>, vector<64x8xbf16>,
    %33 = vector.shape_cast %26 : vector<1x8x8x8xf32> to vector<64x8xf32>
    %34 = arith.truncf %33 : vector<64x8xf32> to vector<64x8xbf16>
    %c0_27 = arith.constant 0 : index
    %c8 = arith.constant 8 : index
    %35 = vector.load %arg10[%c0_27, %c8] : memref<64x72xbf16, #tpu.memory_space<vmem>>, vector<64x8xbf16>
    tpu.vector_store %arg10[%c0_27, %c8], %34 {strides = array<i32>} : memref<64x72xbf16, #tpu.memory_space<vmem>>, vector<64x8xbf16>,
    %c7_i32 = arith.constant 7 : i32
    %36 = tpu.dynamic_rotate %26 by %c7_i32 dim 2 : vector<1x8x8x8xf32>, i32 -> vector<1x8x8x8xf32>
    %cst_28 = arith.constant 0.000000e+00 : f32
    %37 = vector.broadcast %cst_28 : f32 to vector<1x8x8x8xf32>
    %38 = arith.select %25, %36, %37 : vector<1x8x8x8xi1>, vector<1x8x8x8xf32>
    %39 = vector.shape_cast %38 : vector<1x8x8x8xf32> to vector<64x8xf32>
    %40 = arith.truncf %39 : vector<64x8xf32> to vector<64x8xbf16>
    %c0_29 = arith.constant 0 : index
    %c16 = arith.constant 16 : index
    %41 = vector.load %arg10[%c0_29, %c16] : memref<64x72xbf16, #tpu.memory_space<vmem>>, vector<64x8xbf16>
    tpu.vector_store %arg10[%c0_29, %c16], %40 {strides = array<i32>} : memref<64x72xbf16, #tpu.memory_space<vmem>>, vector<64x8xbf16>,
    %c0_30 = arith.constant 0 : index
    %c1_31 = arith.constant 1 : index
    %c0_32 = arith.constant 0 : index
    %c0_33 = arith.constant 0 : index
    %42 = vector.load %arg9[%c0_30, %c1_31, %c0_32, %c0_33] : memref<1x10x8x8xf32, #tpu.memory_space<vmem>>, vector<1x8x8x8xf32>
    %c1_i32_34 = arith.constant 1 : i32
    %43 = tpu.dynamic_rotate %42 by %c1_i32_34 dim 2 : vector<1x8x8x8xf32>, i32 -> vector<1x8x8x8xf32>
    %cst_35 = arith.constant 0.000000e+00 : f32
    %44 = vector.broadcast %cst_35 : f32 to vector<1x8x8x8xf32>
    %45 = arith.select %21, %43, %44 : vector<1x8x8x8xi1>, vector<1x8x8x8xf32>
    %46 = vector.shape_cast %45 : vector<1x8x8x8xf32> to vector<64x8xf32>
    %47 = arith.truncf %46 : vector<64x8xf32> to vector<64x8xbf16>
    %c0_36 = arith.constant 0 : index
    %c24 = arith.constant 24 : index
    %48 = vector.load %arg10[%c0_36, %c24] : memref<64x72xbf16, #tpu.memory_space<vmem>>, vector<64x8xbf16>
    tpu.vector_store %arg10[%c0_36, %c24], %47 {strides = array<i32>} : memref<64x72xbf16, #tpu.memory_space<vmem>>, vector<64x8xbf16>,
    %49 = vector.shape_cast %42 : vector<1x8x8x8xf32> to vector<64x8xf32>
    %50 = arith.truncf %49 : vector<64x8xf32> to vector<64x8xbf16>
    %c0_37 = arith.constant 0 : index
    %c32 = arith.constant 32 : index
    %51 = vector.load %arg10[%c0_37, %c32] : memref<64x72xbf16, #tpu.memory_space<vmem>>, vector<64x8xbf16>
    tpu.vector_store %arg10[%c0_37, %c32], %50 {strides = array<i32>} : memref<64x72xbf16, #tpu.memory_space<vmem>>, vector<64x8xbf16>,
    %c7_i32_38 = arith.constant 7 : i32
    %52 = tpu.dynamic_rotate %42 by %c7_i32_38 dim 2 : vector<1x8x8x8xf32>, i32 -> vector<1x8x8x8xf32>
    %cst_39 = arith.constant 0.000000e+00 : f32
    %53 = vector.broadcast %cst_39 : f32 to vector<1x8x8x8xf32>
    %54 = arith.select %25, %52, %53 : vector<1x8x8x8xi1>, vector<1x8x8x8xf32>
    %55 = vector.shape_cast %54 : vector<1x8x8x8xf32> to vector<64x8xf32>
    %56 = arith.truncf %55 : vector<64x8xf32> to vector<64x8xbf16>
    %c0_40 = arith.constant 0 : index
    %c40 = arith.constant 40 : index
    %57 = vector.load %arg10[%c0_40, %c40] : memref<64x72xbf16, #tpu.memory_space<vmem>>, vector<64x8xbf16>
    tpu.vector_store %arg10[%c0_40, %c40], %56 {strides = array<i32>} : memref<64x72xbf16, #tpu.memory_space<vmem>>, vector<64x8xbf16>,
    %c0_41 = arith.constant 0 : index
    %c2 = arith.constant 2 : index
    %c0_42 = arith.constant 0 : index
    %c0_43 = arith.constant 0 : index
    %58 = vector.load %arg9[%c0_41, %c2, %c0_42, %c0_43] : memref<1x10x8x8xf32, #tpu.memory_space<vmem>>, vector<1x8x8x8xf32>
    %c1_i32_44 = arith.constant 1 : i32
    %59 = tpu.dynamic_rotate %58 by %c1_i32_44 dim 2 : vector<1x8x8x8xf32>, i32 -> vector<1x8x8x8xf32>
    %cst_45 = arith.constant 0.000000e+00 : f32
    %60 = vector.broadcast %cst_45 : f32 to vector<1x8x8x8xf32>
    %61 = arith.select %21, %59, %60 : vector<1x8x8x8xi1>, vector<1x8x8x8xf32>
    %62 = vector.shape_cast %61 : vector<1x8x8x8xf32> to vector<64x8xf32>
    %63 = arith.truncf %62 : vector<64x8xf32> to vector<64x8xbf16>
    %c0_46 = arith.constant 0 : index
    %c48 = arith.constant 48 : index
    %64 = vector.load %arg10[%c0_46, %c48] : memref<64x72xbf16, #tpu.memory_space<vmem>>, vector<64x8xbf16>
    tpu.vector_store %arg10[%c0_46, %c48], %63 {strides = array<i32>} : memref<64x72xbf16, #tpu.memory_space<vmem>>, vector<64x8xbf16>,
    %65 = vector.shape_cast %58 : vector<1x8x8x8xf32> to vector<64x8xf32>
    %66 = arith.truncf %65 : vector<64x8xf32> to vector<64x8xbf16>
    %c0_47 = arith.constant 0 : index
    %c56 = arith.constant 56 : index
    %67 = vector.load %arg10[%c0_47, %c56] : memref<64x72xbf16, #tpu.memory_space<vmem>>, vector<64x8xbf16>
    tpu.vector_store %arg10[%c0_47, %c56], %66 {strides = array<i32>} : memref<64x72xbf16, #tpu.memory_space<vmem>>, vector<64x8xbf16>,
    %c7_i32_48 = arith.constant 7 : i32
    %68 = tpu.dynamic_rotate %58 by %c7_i32_48 dim 2 : vector<1x8x8x8xf32>, i32 -> vector<1x8x8x8xf32>
    %cst_49 = arith.constant 0.000000e+00 : f32
    %69 = vector.broadcast %cst_49 : f32 to vector<1x8x8x8xf32>
    %70 = arith.select %25, %68, %69 : vector<1x8x8x8xi1>, vector<1x8x8x8xf32>
    %71 = vector.shape_cast %70 : vector<1x8x8x8xf32> to vector<64x8xf32>
    %72 = arith.truncf %71 : vector<64x8xf32> to vector<64x8xbf16>
    %c0_50 = arith.constant 0 : index
    %c64 = arith.constant 64 : index
    %73 = vector.load %arg10[%c0_50, %c64] : memref<64x72xbf16, #tpu.memory_space<vmem>>, vector<64x8xbf16>
    tpu.vector_store %arg10[%c0_50, %c64], %72 {strides = array<i32>} : memref<64x72xbf16, #tpu.memory_space<vmem>>, vector<64x8xbf16>,
    %c0_51 = arith.constant 0 : index
    %c0_52 = arith.constant 0 : index
    %74 = vector.load %arg10[%c0_51, %c0_52] : memref<64x72xbf16, #tpu.memory_space<vmem>>, vector<64x72xbf16>
    %c0_53 = arith.constant 0 : index
    %c0_54 = arith.constant 0 : index
    %75 = vector.load %arg4[%c0_53, %c0_54] : memref<72x8xbf16, #tpu.memory_space<vmem>>, vector<72x8xbf16>
    %cst_55 = arith.constant dense<0.000000e+00> : vector<64x8xf32>
    %76 = tpu.matmul %74, %75, %cst_55 {dimension_numbers = #tpu.dot_dimension_numbers<[1], [0], [0], [1], [0, 0, 1, 1], [], []>} : vector<64x72xbf16>, vector<72x8xbf16>, vector<64x8xf32> -> vector<64x8xf32>
    %77 = vector.broadcast %1 : f32 to vector<64x8xf32>
    %78 = arith.addf %76, %77 : vector<64x8xf32>
    %cst_56 = arith.constant 0.000000e+00 : f32
    %79 = vector.broadcast %cst_56 : f32 to vector<64x8xf32>
    %80 = arith.maximumf %78, %79 : vector<64x8xf32>
    %81 = arith.truncf %80 : vector<64x8xf32> to vector<64x8xbf16>
    %c0_57 = arith.constant 0 : index
    %c0_58 = arith.constant 0 : index
    %82 = vector.load %arg5[%c0_57, %c0_58] : memref<8x32xbf16, #tpu.memory_space<vmem>>, vector<8x32xbf16>
    %cst_59 = arith.constant dense<0.000000e+00> : vector<64x32xf32>
    %83 = tpu.matmul %81, %82, %cst_59 {dimension_numbers = #tpu.dot_dimension_numbers<[1], [0], [0], [1], [0, 0, 1, 1], [], []>} : vector<64x8xbf16>, vector<8x32xbf16>, vector<64x32xf32> -> vector<64x32xf32>
    %c0_60 = arith.constant 0 : index
    %c0_61 = arith.constant 0 : index
    %84 = vector.load %arg2[%c0_60, %c0_61] : memref<64x32xbf16, #tpu.memory_space<vmem>>, vector<64x32xbf16>
    %85 = arith.extf %84 : vector<64x32xbf16> to vector<64x32xf32>
    %c0_62 = arith.constant 0 : index
    %c0_63 = arith.constant 0 : index
    %86 = vector.load %arg7[%c0_62, %c0_63] : memref<1x32xf32, #tpu.memory_space<vmem>>, vector<1x32xf32>
    %87 = vector.broadcast %86 : vector<1x32xf32> to vector<64x32xf32>
    %88 = arith.addf %83, %87 : vector<64x32xf32>
    %89 = arith.addf %88, %85 : vector<64x32xf32>
    %cst_64 = arith.constant 0.000000e+00 : f32
    %90 = vector.broadcast %cst_64 : f32 to vector<64x32xf32>
    %91 = arith.maximumf %89, %90 : vector<64x32xf32>
    %92 = arith.truncf %91 : vector<64x32xf32> to vector<64x32xbf16>
    %c0_65 = arith.constant 0 : index
    %c0_66 = arith.constant 0 : index
    %93 = vector.load %arg8[%c0_65, %c0_66] : memref<64x32xbf16, #tpu.memory_space<vmem>>, vector<64x32xbf16>
    tpu.vector_store %arg8[%c0_65, %c0_66], %92 {strides = array<i32>} : memref<64x32xbf16, #tpu.memory_space<vmem>>, vector<64x32xbf16>,
    return
  }
  func.func @transform_0(%arg0: i32, %arg1: memref<2xf32, #tpu.memory_space<smem>>) -> (i32, i32) {
    %c0_i32 = arith.constant 0 : i32
    %c0_i32_0 = arith.constant 0 : i32
    return %arg0, %c0_i32 : i32, i32
  }
  func.func @transform_1(%arg0: i32, %arg1: memref<2xf32, #tpu.memory_space<smem>>) -> (i32, i32) {
    %c0_i32 = arith.constant 0 : i32
    %c0_i32_0 = arith.constant 0 : i32
    %c0_i32_1 = arith.constant 0 : i32
    return %c0_i32, %c0_i32_0 : i32, i32
  }
  func.func @transform_2(%arg0: i32, %arg1: memref<2xf32, #tpu.memory_space<smem>>) -> (i32, i32) {
    %c0_i32 = arith.constant 0 : i32
    %c0_i32_0 = arith.constant 0 : i32
    %c0_i32_1 = arith.constant 0 : i32
    return %c0_i32, %c0_i32_0 : i32, i32
  }
  func.func @transform_3(%arg0: i32, %arg1: memref<2xf32, #tpu.memory_space<smem>>) -> (i32, i32) {
    %c0_i32 = arith.constant 0 : i32
    %c0_i32_0 = arith.constant 0 : i32
    %c0_i32_1 = arith.constant 0 : i32
    return %c0_i32, %c0_i32_0 : i32, i32
  }
  func.func @transform_4(%arg0: i32, %arg1: memref<2xf32, #tpu.memory_space<smem>>) -> (i32, i32) {
    %c0_i32 = arith.constant 0 : i32
    %c0_i32_0 = arith.constant 0 : i32
    %c0_i32_1 = arith.constant 0 : i32
    return %c0_i32, %c0_i32_0 : i32, i32
  }
  func.func @transform_5(%arg0: i32, %arg1: memref<2xf32, #tpu.memory_space<smem>>) -> (i32, i32) {
    %c0_i32 = arith.constant 0 : i32
    %c0_i32_0 = arith.constant 0 : i32
    %c0_i32_1 = arith.constant 0 : i32
    return %c0_i32, %c0_i32_0 : i32, i32
  }
  func.func @transform_6(%arg0: i32, %arg1: memref<2xf32, #tpu.memory_space<smem>>) -> (i32, i32) {
    %c0_i32 = arith.constant 0 : i32
    %c0_i32_0 = arith.constant 0 : i32
    return %arg0, %c0_i32 : i32, i32
  }
}

module attributes {stable_mosaic.version = 11 : i64} {
  func.func @_bottleneck_kernel(%arg0: i32, %arg1: memref<2xf32, #tpu.memory_space<smem>>, %arg2: memref<64x32xbf16, #tpu.memory_space<vmem>>, %arg3: memref<32x8xbf16, #tpu.memory_space<vmem>>, %arg4: memref<72x8xbf16, #tpu.memory_space<vmem>>, %arg5: memref<8x32xbf16, #tpu.memory_space<vmem>>, %arg6: memref<1x8xf32, #tpu.memory_space<vmem>>, %arg7: memref<1x32xf32, #tpu.memory_space<vmem>>, %arg8: memref<64x32xbf16, #tpu.memory_space<vmem>>, %arg9: memref<1x10x8x8xf32, #tpu.memory_space<vmem>>, %arg10: memref<64x72xbf16, #tpu.memory_space<vmem>>) attributes {dimension_semantics = [#tpu.dimension_semantics<parallel>], iteration_bounds = array<i64: 2>, scalar_prefetch = 1 : i64, scratch_operands = 2 : i64, tpu.core_type = #tpu.core_type<tc>, window_params = [{transform_indices = @transform_0, window_bounds = array<i64: 64, 32>}, {pipeline_mode = #tpu.pipeline_mode<synchronous>, transform_indices = @transform_1, window_bounds = array<i64: 32, 8>}, {pipeline_mode = #tpu.pipeline_mode<synchronous>, transform_indices = @transform_2, window_bounds = array<i64: 72, 8>}, {pipeline_mode = #tpu.pipeline_mode<synchronous>, transform_indices = @transform_3, window_bounds = array<i64: 8, 32>}, {pipeline_mode = #tpu.pipeline_mode<synchronous>, transform_indices = @transform_4, window_bounds = array<i64: 1, 8>}, {pipeline_mode = #tpu.pipeline_mode<synchronous>, transform_indices = @transform_5, window_bounds = array<i64: 1, 32>}, {transform_indices = @transform_6, window_bounds = array<i64: 64, 32>}]} {
    %c0 = arith.constant 0 : index
    %0 = memref.load %arg1[%c0] : memref<2xf32, #tpu.memory_space<smem>>
    %c1 = arith.constant 1 : index
    %1 = memref.load %arg1[%c1] : memref<2xf32, #tpu.memory_space<smem>>
    %c0_0 = arith.constant 0 : index
    %c0_1 = arith.constant 0 : index
    %2 = vector.load %arg2[%c0_0, %c0_1] : memref<64x32xbf16, #tpu.memory_space<vmem>>, vector<64x32xbf16>
    %c0_2 = arith.constant 0 : index
    %c0_3 = arith.constant 0 : index
    %3 = vector.load %arg3[%c0_2, %c0_3] : memref<32x8xbf16, #tpu.memory_space<vmem>>, vector<32x8xbf16>
    %cst = arith.constant dense<0.000000e+00> : vector<64x8xf32>
    %4 = tpu.matmul %2, %3, %cst {dimension_numbers = #tpu.dot_dimension_numbers<[1], [0], [0], [1], [0, 0, 1, 1], [], []>} : vector<64x32xbf16>, vector<32x8xbf16>, vector<64x8xf32> -> vector<64x8xf32>
    %c0_4 = arith.constant 0 : index
    %c0_5 = arith.constant 0 : index
    %5 = vector.load %arg6[%c0_4, %c0_5] : memref<1x8xf32, #tpu.memory_space<vmem>>, vector<1x8xf32>
    %6 = vector.broadcast %5 : vector<1x8xf32> to vector<64x8xf32>
    %7 = arith.addf %4, %6 : vector<64x8xf32>
    %cst_6 = arith.constant 0.000000e+00 : f32
    %8 = vector.broadcast %cst_6 : f32 to vector<64x8xf32>
    %9 = arith.maximumf %7, %8 : vector<64x8xf32>
    %10 = vector.broadcast %0 : f32 to vector<64x8xf32>
    %11 = arith.addf %9, %10 : vector<64x8xf32>
    %12 = vector.shape_cast %11 : vector<64x8xf32> to vector<1x8x8x8xf32>
    %cst_7 = arith.constant 0.000000e+00 : f32
    %13 = vector.broadcast %cst_7 : f32 to vector<1x1x8x8xf32>
    %c0_8 = arith.constant 0 : index
    %c0_9 = arith.constant 0 : index
    %c0_10 = arith.constant 0 : index
    %c0_11 = arith.constant 0 : index
    %14 = vector.load %arg9[%c0_8, %c0_9, %c0_10, %c0_11] : memref<1x10x8x8xf32, #tpu.memory_space<vmem>>, vector<1x1x8x8xf32>
    tpu.vector_store %arg9[%c0_8, %c0_9, %c0_10, %c0_11], %13 {strides = array<i32>} : memref<1x10x8x8xf32, #tpu.memory_space<vmem>>, vector<1x1x8x8xf32>,
    %c0_12 = arith.constant 0 : index
    %c9 = arith.constant 9 : index
    %c0_13 = arith.constant 0 : index
    %c0_14 = arith.constant 0 : index
    %15 = vector.load %arg9[%c0_12, %c9, %c0_13, %c0_14] : memref<1x10x8x8xf32, #tpu.memory_space<vmem>>, vector<1x1x8x8xf32>
    tpu.vector_store %arg9[%c0_12, %c9, %c0_13, %c0_14], %13 {strides = array<i32>} : memref<1x10x8x8xf32, #tpu.memory_space<vmem>>, vector<1x1x8x8xf32>,
    %c0_15 = arith.constant 0 : index
    %c1_16 = arith.constant 1 : index
    %c0_17 = arith.constant 0 : index
    %c0_18 = arith.constant 0 : index
    %16 = vector.load %arg9[%c0_15, %c1_16, %c0_17, %c0_18] : memref<1x10x8x8xf32, #tpu.memory_space<vmem>>, vector<1x8x8x8xf32>
    tpu.vector_store %arg9[%c0_15, %c1_16, %c0_17, %c0_18], %12 {strides = array<i32>} : memref<1x10x8x8xf32, #tpu.memory_space<vmem>>, vector<1x8x8x8xf32>,
    %17 = tpu.iota {dimensions = array<i32: 2>} : vector<1x1x8x1xi32>
    %c1_i32 = arith.constant 1 : i32
    %18 = vector.broadcast %c1_i32 : i32 to vector<1x1x8x1xi32>
    %19 = arith.cmpi sge, %17, %18 : vector<1x1x8x1xi32>
    %20 = vector.shape_cast %19 : vector<1x1x8x1xi1> to vector<1x1x8x1xi1>
    %21 = vector.broadcast %20 : vector<1x1x8x1xi1> to vector<1x8x8x8xi1>
    %c6_i32 = arith.constant 6 : i32
    %22 = vector.broadcast %c6_i32 : i32 to vector<1x1x8x1xi32>
    %23 = arith.cmpi sle, %17, %22 : vector<1x1x8x1xi32>
    %24 = vector.shape_cast %23 : vector<1x1x8x1xi1> to vector<1x1x8x1xi1>
    %25 = vector.broadcast %24 : vector<1x1x8x1xi1> to vector<1x8x8x8xi1>
    %c0_19 = arith.constant 0 : index
    %c0_20 = arith.constant 0 : index
    %c0_21 = arith.constant 0 : index
    %c0_22 = arith.constant 0 : index
    %26 = vector.load %arg9[%c0_19, %c0_20, %c0_21, %c0_22] : memref<1x10x8x8xf32, #tpu.memory_space<vmem>>, vector<1x8x8x8xf32>
    %c1_i32_23 = arith.constant 1 : i32
    %27 = tpu.dynamic_rotate %26 by %c1_i32_23 dim 2 : vector<1x8x8x8xf32>, i32 -> vector<1x8x8x8xf32>
    %cst_24 = arith.constant 0.000000e+00 : f32
    %28 = vector.broadcast %cst_24 : f32 to vector<1x8x8x8xf32>
    %29 = arith.select %21, %27, %28 : vector<1x8x8x8xi1>, vector<1x8x8x8xf32>
    %30 = vector.shape_cast %29 : vector<1x8x8x8xf32> to vector<64x8xf32>
    %31 = arith.truncf %30 : vector<64x8xf32> to vector<64x8xbf16>
    %c0_25 = arith.constant 0 : index
    %c0_26 = arith.constant 0 : index
    %32 = vector.load %arg10[%c0_25, %c0_26] : memref<64x72xbf16, #tpu.memory_space<vmem>>, vector<64x8xbf16>
    tpu.vector_store %arg10[%c0_25, %c0_26], %31 {strides = array<i32>} : memref<64x72xbf16, #tpu.memory_space<vmem>>, vector<64x8xbf16>,
    %33 = vector.shape_cast %26 : vector<1x8x8x8xf32> to vector<64x8xf32>
    %34 = arith.truncf %33 : vector<64x8xf32> to vector<64x8xbf16>
    %c0_27 = arith.constant 0 : index
    %c8 = arith.constant 8 : index
    %35 = vector.load %arg10[%c0_27, %c8] : memref<64x72xbf16, #tpu.memory_space<vmem>>, vector<64x8xbf16>
    tpu.vector_store %arg10[%c0_27, %c8], %34 {strides = array<i32>} : memref<64x72xbf16, #tpu.memory_space<vmem>>, vector<64x8xbf16>,
    %c7_i32 = arith.constant 7 : i32
    %36 = tpu.dynamic_rotate %26 by %c7_i32 dim 2 : vector<1x8x8x8xf32>, i32 -> vector<1x8x8x8xf32>
    %cst_28 = arith.constant 0.000000e+00 : f32
    %37 = vector.broadcast %cst_28 : f32 to vector<1x8x8x8xf32>
    %38 = arith.select %25, %36, %37 : vector<1x8x8x8xi1>, vector<1x8x8x8xf32>
    %39 = vector.shape_cast %38 : vector<1x8x8x8xf32> to vector<64x8xf32>
    %40 = arith.truncf %39 : vector<64x8xf32> to vector<64x8xbf16>
    %c0_29 = arith.constant 0 : index
    %c16 = arith.constant 16 : index
    %41 = vector.load %arg10[%c0_29, %c16] : memref<64x72xbf16, #tpu.memory_space<vmem>>, vector<64x8xbf16>
    tpu.vector_store %arg10[%c0_29, %c16], %40 {strides = array<i32>} : memref<64x72xbf16, #tpu.memory_space<vmem>>, vector<64x8xbf16>,
    %c0_30 = arith.constant 0 : index
    %c1_31 = arith.constant 1 : index
    %c0_32 = arith.constant 0 : index
    %c0_33 = arith.constant 0 : index
    %42 = vector.load %arg9[%c0_30, %c1_31, %c0_32, %c0_33] : memref<1x10x8x8xf32, #tpu.memory_space<vmem>>, vector<1x8x8x8xf32>
    %c1_i32_34 = arith.constant 1 : i32
    %43 = tpu.dynamic_rotate %42 by %c1_i32_34 dim 2 : vector<1x8x8x8xf32>, i32 -> vector<1x8x8x8xf32>
    %cst_35 = arith.constant 0.000000e+00 : f32
    %44 = vector.broadcast %cst_35 : f32 to vector<1x8x8x8xf32>
    %45 = arith.select %21, %43, %44 : vector<1x8x8x8xi1>, vector<1x8x8x8xf32>
    %46 = vector.shape_cast %45 : vector<1x8x8x8xf32> to vector<64x8xf32>
    %47 = arith.truncf %46 : vector<64x8xf32> to vector<64x8xbf16>
    %c0_36 = arith.constant 0 : index
    %c24 = arith.constant 24 : index
    %48 = vector.load %arg10[%c0_36, %c24] : memref<64x72xbf16, #tpu.memory_space<vmem>>, vector<64x8xbf16>
    tpu.vector_store %arg10[%c0_36, %c24], %47 {strides = array<i32>} : memref<64x72xbf16, #tpu.memory_space<vmem>>, vector<64x8xbf16>,
    %49 = vector.shape_cast %42 : vector<1x8x8x8xf32> to vector<64x8xf32>
    %50 = arith.truncf %49 : vector<64x8xf32> to vector<64x8xbf16>
    %c0_37 = arith.constant 0 : index
    %c32 = arith.constant 32 : index
    %51 = vector.load %arg10[%c0_37, %c32] : memref<64x72xbf16, #tpu.memory_space<vmem>>, vector<64x8xbf16>
    tpu.vector_store %arg10[%c0_37, %c32], %50 {strides = array<i32>} : memref<64x72xbf16, #tpu.memory_space<vmem>>, vector<64x8xbf16>,
    %c7_i32_38 = arith.constant 7 : i32
    %52 = tpu.dynamic_rotate %42 by %c7_i32_38 dim 2 : vector<1x8x8x8xf32>, i32 -> vector<1x8x8x8xf32>
    %cst_39 = arith.constant 0.000000e+00 : f32
    %53 = vector.broadcast %cst_39 : f32 to vector<1x8x8x8xf32>
    %54 = arith.select %25, %52, %53 : vector<1x8x8x8xi1>, vector<1x8x8x8xf32>
    %55 = vector.shape_cast %54 : vector<1x8x8x8xf32> to vector<64x8xf32>
    %56 = arith.truncf %55 : vector<64x8xf32> to vector<64x8xbf16>
    %c0_40 = arith.constant 0 : index
    %c40 = arith.constant 40 : index
    %57 = vector.load %arg10[%c0_40, %c40] : memref<64x72xbf16, #tpu.memory_space<vmem>>, vector<64x8xbf16>
    tpu.vector_store %arg10[%c0_40, %c40], %56 {strides = array<i32>} : memref<64x72xbf16, #tpu.memory_space<vmem>>, vector<64x8xbf16>,
    %c0_41 = arith.constant 0 : index
    %c2 = arith.constant 2 : index
    %c0_42 = arith.constant 0 : index
    %c0_43 = arith.constant 0 : index
    %58 = vector.load %arg9[%c0_41, %c2, %c0_42, %c0_43] : memref<1x10x8x8xf32, #tpu.memory_space<vmem>>, vector<1x8x8x8xf32>
    %c1_i32_44 = arith.constant 1 : i32
    %59 = tpu.dynamic_rotate %58 by %c1_i32_44 dim 2 : vector<1x8x8x8xf32>, i32 -> vector<1x8x8x8xf32>
    %cst_45 = arith.constant 0.000000e+00 : f32
    %60 = vector.broadcast %cst_45 : f32 to vector<1x8x8x8xf32>
    %61 = arith.select %21, %59, %60 : vector<1x8x8x8xi1>, vector<1x8x8x8xf32>
    %62 = vector.shape_cast %61 : vector<1x8x8x8xf32> to vector<64x8xf32>
    %63 = arith.truncf %62 : vector<64x8xf32> to vector<64x8xbf16>
    %c0_46 = arith.constant 0 : index
    %c48 = arith.constant 48 : index
    %64 = vector.load %arg10[%c0_46, %c48] : memref<64x72xbf16, #tpu.memory_space<vmem>>, vector<64x8xbf16>
    tpu.vector_store %arg10[%c0_46, %c48], %63 {strides = array<i32>} : memref<64x72xbf16, #tpu.memory_space<vmem>>, vector<64x8xbf16>,
    %65 = vector.shape_cast %58 : vector<1x8x8x8xf32> to vector<64x8xf32>
    %66 = arith.truncf %65 : vector<64x8xf32> to vector<64x8xbf16>
    %c0_47 = arith.constant 0 : index
    %c56 = arith.constant 56 : index
    %67 = vector.load %arg10[%c0_47, %c56] : memref<64x72xbf16, #tpu.memory_space<vmem>>, vector<64x8xbf16>
    tpu.vector_store %arg10[%c0_47, %c56], %66 {strides = array<i32>} : memref<64x72xbf16, #tpu.memory_space<vmem>>, vector<64x8xbf16>,
    %c7_i32_48 = arith.constant 7 : i32
    %68 = tpu.dynamic_rotate %58 by %c7_i32_48 dim 2 : vector<1x8x8x8xf32>, i32 -> vector<1x8x8x8xf32>
    %cst_49 = arith.constant 0.000000e+00 : f32
    %69 = vector.broadcast %cst_49 : f32 to vector<1x8x8x8xf32>
    %70 = arith.select %25, %68, %69 : vector<1x8x8x8xi1>, vector<1x8x8x8xf32>
    %71 = vector.shape_cast %70 : vector<1x8x8x8xf32> to vector<64x8xf32>
    %72 = arith.truncf %71 : vector<64x8xf32> to vector<64x8xbf16>
    %c0_50 = arith.constant 0 : index
    %c64 = arith.constant 64 : index
    %73 = vector.load %arg10[%c0_50, %c64] : memref<64x72xbf16, #tpu.memory_space<vmem>>, vector<64x8xbf16>
    tpu.vector_store %arg10[%c0_50, %c64], %72 {strides = array<i32>} : memref<64x72xbf16, #tpu.memory_space<vmem>>, vector<64x8xbf16>,
    %c0_51 = arith.constant 0 : index
    %c0_52 = arith.constant 0 : index
    %74 = vector.load %arg10[%c0_51, %c0_52] : memref<64x72xbf16, #tpu.memory_space<vmem>>, vector<64x72xbf16>
    %c0_53 = arith.constant 0 : index
    %c0_54 = arith.constant 0 : index
    %75 = vector.load %arg4[%c0_53, %c0_54] : memref<72x8xbf16, #tpu.memory_space<vmem>>, vector<72x8xbf16>
    %cst_55 = arith.constant dense<0.000000e+00> : vector<64x8xf32>
    %76 = tpu.matmul %74, %75, %cst_55 {dimension_numbers = #tpu.dot_dimension_numbers<[1], [0], [0], [1], [0, 0, 1, 1], [], []>} : vector<64x72xbf16>, vector<72x8xbf16>, vector<64x8xf32> -> vector<64x8xf32>
    %77 = vector.broadcast %1 : f32 to vector<64x8xf32>
    %78 = arith.addf %76, %77 : vector<64x8xf32>
    %cst_56 = arith.constant 0.000000e+00 : f32
    %79 = vector.broadcast %cst_56 : f32 to vector<64x8xf32>
    %80 = arith.maximumf %78, %79 : vector<64x8xf32>
    %81 = arith.truncf %80 : vector<64x8xf32> to vector<64x8xbf16>
    %c0_57 = arith.constant 0 : index
    %c0_58 = arith.constant 0 : index
    %82 = vector.load %arg5[%c0_57, %c0_58] : memref<8x32xbf16, #tpu.memory_space<vmem>>, vector<8x32xbf16>
    %cst_59 = arith.constant dense<0.000000e+00> : vector<64x32xf32>
    %83 = tpu.matmul %81, %82, %cst_59 {dimension_numbers = #tpu.dot_dimension_numbers<[1], [0], [0], [1], [0, 0, 1, 1], [], []>} : vector<64x8xbf16>, vector<8x32xbf16>, vector<64x32xf32> -> vector<64x32xf32>
    %c0_60 = arith.constant 0 : index
    %c0_61 = arith.constant 0 : index
    %84 = vector.load %arg2[%c0_60, %c0_61] : memref<64x32xbf16, #tpu.memory_space<vmem>>, vector<64x32xbf16>
    %85 = arith.extf %84 : vector<64x32xbf16> to vector<64x32xf32>
    %c0_62 = arith.constant 0 : index
    %c0_63 = arith.constant 0 : index
    %86 = vector.load %arg7[%c0_62, %c0_63] : memref<1x32xf32, #tpu.memory_space<vmem>>, vector<1x32xf32>
    %87 = vector.broadcast %86 : vector<1x32xf32> to vector<64x32xf32>
    %88 = arith.addf %83, %87 : vector<64x32xf32>
    %89 = arith.addf %88, %85 : vector<64x32xf32>
    %cst_64 = arith.constant 0.000000e+00 : f32
    %90 = vector.broadcast %cst_64 : f32 to vector<64x32xf32>
    %91 = arith.maximumf %89, %90 : vector<64x32xf32>
    %92 = arith.truncf %91 : vector<64x32xf32> to vector<64x32xbf16>
    %c0_65 = arith.constant 0 : index
    %c0_66 = arith.constant 0 : index
    %93 = vector.load %arg8[%c0_65, %c0_66] : memref<64x32xbf16, #tpu.memory_space<vmem>>, vector<64x32xbf16>
    tpu.vector_store %arg8[%c0_65, %c0_66], %92 {strides = array<i32>} : memref<64x32xbf16, #tpu.memory_space<vmem>>, vector<64x32xbf16>,
    return
  }
  func.func @transform_0(%arg0: i32, %arg1: memref<2xf32, #tpu.memory_space<smem>>) -> (i32, i32) {
    %c0_i32 = arith.constant 0 : i32
    %c0_i32_0 = arith.constant 0 : i32
    return %arg0, %c0_i32 : i32, i32
  }
  func.func @transform_1(%arg0: i32, %arg1: memref<2xf32, #tpu.memory_space<smem>>) -> (i32, i32) {
    %c0_i32 = arith.constant 0 : i32
    %c0_i32_0 = arith.constant 0 : i32
    %c0_i32_1 = arith.constant 0 : i32
    return %c0_i32, %c0_i32_0 : i32, i32
  }
  func.func @transform_2(%arg0: i32, %arg1: memref<2xf32, #tpu.memory_space<smem>>) -> (i32, i32) {
    %c0_i32 = arith.constant 0 : i32
    %c0_i32_0 = arith.constant 0 : i32
    %c0_i32_1 = arith.constant 0 : i32
    return %c0_i32, %c0_i32_0 : i32, i32
  }
  func.func @transform_3(%arg0: i32, %arg1: memref<2xf32, #tpu.memory_space<smem>>) -> (i32, i32) {
    %c0_i32 = arith.constant 0 : i32
    %c0_i32_0 = arith.constant 0 : i32
    %c0_i32_1 = arith.constant 0 : i32
    return %c0_i32, %c0_i32_0 : i32, i32
  }
  func.func @transform_4(%arg0: i32, %arg1: memref<2xf32, #tpu.memory_space<smem>>) -> (i32, i32) {
    %c0_i32 = arith.constant 0 : i32
    %c0_i32_0 = arith.constant 0 : i32
    %c0_i32_1 = arith.constant 0 : i32
    return %c0_i32, %c0_i32_0 : i32, i32
  }
  func.func @transform_5(%arg0: i32, %arg1: memref<2xf32, #tpu.memory_space<smem>>) -> (i32, i32) {
    %c0_i32 = arith.constant 0 : i32
    %c0_i32_0 = arith.constant 0 : i32
    %c0_i32_1 = arith.constant 0 : i32
    return %c0_i32, %c0_i32_0 : i32, i32
  }
  func.func @transform_6(%arg0: i32, %arg1: memref<2xf32, #tpu.memory_space<smem>>) -> (i32, i32) {
    %c0_i32 = arith.constant 0 : i32
    %c0_i32_0 = arith.constant 0 : i32
    return %arg0, %c0_i32 : i32, i32
  }
}

</mosaic_0001>

<bundles_post_ra>
// kernel: tpu_custom_call.1
= control target key start
LH: loop header
LB: loop body
LE: loop exit
PB: predicated region body
PF: predicated region fallthrough
CT: control target
= control target key end

     0   :  { %s1597_s0 = inlined_call_operand.vmem [shape: f32[2], index: 0, kind: input, shape index: {}]   ;;  %s1598_s1 = inlined_call_operand.vmem [shape: bf16[128,32], index: 1, kind: input, shape index: {}]   ;;  %s1599_s2 = inlined_call_operand.vmem [shape: bf16[32,8], index: 2, kind: input, shape index: {}]   ;;  %s1600_s3 = inlined_call_operand.vmem [shape: bf16[72,8], index: 3, kind: input, shape index: {}]   ;;  %s1601_s4 = inlined_call_operand.vmem [shape: bf16[8,32], index: 4, kind: input, shape index: {}]   ;;  %s1602_s5 = inlined_call_operand.vmem [shape: f32[1,8], index: 5, kind: input, shape index: {}]   ;;  %s1603_s6 = inlined_call_operand.vmem [shape: f32[1,32], index: 6, kind: input, shape index: {}]   ;;  %s1604_s7 = inlined_call_operand.vmem [shape: bf16[128,32], index: 7, kind: output, shape index: {}]  }
   0x1   :  { %s12_s26 = sshll.u32 %s1597_s0, 4  ;;  %s13_s26 = int_to_ptr.vmem [resolvable:$true] %s12_s26 }
   0x2   :  { %s1276_s27 = scalar_lea.vmem %s13_s26, 16  ;;  %p1281_p1 = scmp.lt.s32.totalorder %s13_s26, %s13_s26 }
   0x3   :  { %p1277_p0 = scmp.ne.s32.totalorder %s13_s26, %s1276_s27  ;;  %p1282_p2 = scmp.lt.s32.totalorder %s1276_s27, %s1276_s27 }
   0x5   :  { %p1283_p3 = por %p1282_p2, %p1281_p1 }
   0x7   :  { %p1284_p4 = pnand %p1283_p3, %p1277_p0 }
   0x9   :  { %1287 = shalt.err (!%p1284_p4)  }
   0xa   :  { %s1298_s28 = smov [#allocation5]  }
   0xb   :  { %15 = dma.vmem_to_smem %s13_s26, 16, %s1298_s28, [#allocation4] }
   0xc   :  { %1292 = dma.done.wait [#allocation4], 16 }
   0xd   :  { %1293 = vsyncadd [#allocation4], 4294967280 }
   0xe   :  { %17 = sfence }
   0xf   :  { %s1351_s29 = smov 0  }
  0x10 LB: > { %s1113_s0 = sadd.s32 4294967295, %s1296_s29   ;;  %p1117_p5 = scmp.ge.s32.totalorder %s1296_s29, 1  ;;  %s1296_s29 = sphi %s1351_s29, %s23_s29  }
  0x11   : > { %p220_p6 = scmp.lt.s32.totalorder %s1296_s29, 3 }
  0x13   : > { %p221_p7 = pnand %p1117_p5, %p220_p6 }
  0x14   : > { %v1265_v0 = vld [vmem:[%s1599_s2] sm:$0xff] (!%p221_p7)   ;;  %s1118_s9 = sshll.u32 (!%p221_p7), %s1113_s0, 3  ;;  %v1266_v1 = vld [vmem:[%s1599_s2 + $0x8] sm:$0xff] (!%p221_p7)   ;;  %vm316_vm0 = vcmask (!%p221_p7), 261120   ;;  %vm411_vm1 = vcmask (!%p221_p7), 64512   ;;  %v1299_v6 = vmov (!%p221_p7), 0.0   ;;  %v424_v23 = vlaneseq (!%p221_p7) }
  0x15   : > { %224 = sbr.rel (%p221_p7) target bundleno = 892 (0x37c), region = 44  ;;  %p251_p8 = scmp.lt.s32.totalorder (!%p221_p7), %s1118_s9, 15  ;;  %1205 = vmatprep.subr.bf16.mxu0 (!%p221_p7), %v1265_v0  ;;  %412 = vst.msk [vmem:[#allocation2] sm:$0xff] (!%p221_p7), %vm411_vm1, %v1299_v6  ;;  %414 = vst.msk [vmem:[#allocation2 + $0x48] sm:$0xff] (!%p221_p7), %vm411_vm1, %v1299_v6  ;;  %v1123_v7 = vld [vmem:[%s1602_s5] ss:$0 sm:$0xff] (!%p221_p7) }
  0x16   : > { %1206 = vmatpush3.bf16.msra.mxu0 (!%p221_p7), %v1265_v0  ;;  %s263_s16 = sld [smem:[#allocation5]] (!%p221_p7)  ;;  %v1388_v32 = vshrl.u32 (!%p221_p7), %v424_v23, 7  ;;  %s1300_s19 = smov (!%p221_p7), 8   ;;  %vm815_vm4 = vcmask (!%p221_p7), 1043456   ;;  %vm484_vm5 = vcmask (!%p221_p7), 130112   ;;  %vm525_vm6 = vcmask (!%p221_p7), 195712  }
  0x17   : > { %1207 = vmatprep.subr.bf16.mxu0 (!%p221_p7), %v1266_v1  ;;  %s1301_s20 = smov (!%p221_p7), 32   ;;  %s1302_s21 = smov (!%p221_p7), 16   ;;  %vm574_vm7 = vcmask (!%p221_p7), 261312   ;;  %vm599_vm8 = vcmask (!%p221_p7), 326912   ;;  %vm640_vm9 = vcmask (!%p221_p7), 392512   ;;  %vm690_vm10 = vcmask (!%p221_p7), 458112  }
  0x18   : > { %vm429_vm2 = vcmp.le.s32.totalorder (!%p221_p7), %v1388_v32, 6  ;;  %vm426_vm3 = vcmp.ge.s32.totalorder (!%p221_p7), %v1388_v32, 1  ;;  %s1303_s22 = smov (!%p221_p7), 24   ;;  %s1304_s23 = smov (!%p221_p7), 56   ;;  %vm715_vm11 = vcmask (!%p221_p7), 523712   ;;  %vm756_vm12 = vcmask (!%p221_p7), 589312  }
  0x19   : > { %s1305_s24 = smov (!%p221_p7), 40   ;;  %s1306_s8 = smov (!%p221_p7), 48   ;;  %vm802_vm13 = vcmask (!%p221_p7), 588800   ;;  %vm1048_vm14 = vcmask (!%p221_p7), 257024  }
  0x1a   : > { %1208 = vmatpush3.bf16.msra.mxu0 (!%p221_p7), %v1266_v1  ;;  %s1307_s13 = smov (!%p221_p7), 64  }
  0x1c   : > { %s1606_s9 = smov (!%p251_p8, %s1118_s9), 15  ;;  %v402_v11 = vstv %s263_s16  ;;  %v432_v30 = vld [vmem:[#allocation2] sm:$0xff] }
  0x1d   : > { %s1119_s12 = sshll.u32 %s1606_s9, 2  ;;  %v489_v39 = vrot.slane %v432_v30, 1  ;;  %v440_v44 = vrot.slane %v432_v30, 7 }
  0x1e   : > { %s1373_s15 = scalar_lea.vmem %s1598_s1, %s1119_s12 }
  0x1f   : > { %v1267_v2 = vld [vmem:[%s1373_s15] sm:$0xff]   ;;  %v1268_v3 = vld [vmem:[%s1373_s15 + $0x8] sm:$0xff]   ;;  %v1269_v4 = vld [vmem:[%s1373_s15 + $0x10] sm:$0xff]   ;;  %v497_v54 = vsel %vm429_vm2, %v489_v39, 0.0  ;;  %v448_v59 = vsel %vm426_vm3, %v440_v44, 0.0 }
  0x20   : > { %1209 = vmatprep.mubr.msk.bf16.mxu0 %vm316_vm0, %v1267_v2  ;;  %v1270_v5 = vld [vmem:[%s1373_s15 + $0x18] sm:$0xff]  }
  0x21   : > { %1210 = vmatmul.mubr.msk.bf16.vlgmr.msra.gmra.mrb[0].mxu0 %vm316_vm0, %v1268_v3 }
  0x22   : > { %1213 = vmatprep.mubr.msk.bf16.mxu0 %vm316_vm0, %v1269_v4 }
  0x29   : > { %1214 = vmatmul.mubr.msk.bf16.gmra.mrb[4].mxu0 %vm316_vm0, %v1270_v5 }
  0xf4   : > { %v1211_v8 = vpop.f32.mrb[0].mxu0 }
  0xf5   : > { %v372_v9 = vadd.f32 %v1211_v8, %v1123_v7  ;;  %v363_v10 = vpop.f32.mrb[1].mxu0 }
  0xf6   : > { %v364_v12 = vadd.f32 %v1123_v7, %v363_v10  ;;  %v1212_v13 = vpop.f32.mrb[2].mxu0 }
  0xf7   : > { %v396_v14 = vmax.f32 %v372_v9, 0.0  ;;  %v375_v15 = vadd.f32 %v1212_v13, %v1123_v7  ;;  %v366_v16 = vpop.f32.mrb[3].mxu0 }
  0xf8   : > { %v394_v17 = vmax.f32 %v364_v12, 0.0  ;;  %v367_v18 = vadd.f32 %v1123_v7, %v366_v16 }
  0xf9   : > { %v405_v19 = vadd.f32 %v402_v11, %v396_v14  ;;  %v397_v20 = vmax.f32 %v375_v15, 0.0 }
  0xfa   : > { %v403_v21 = vadd.f32 %v402_v11, %v394_v17  ;;  %v395_v22 = vmax.f32 %v367_v18, 0.0 }
  0xfb   : > { %418 = vst.msk [vmem:[#allocation2 + $0x18] sm:$0xff] %vm411_vm1, %v405_v19  ;;  %v406_v24 = vadd.f32 %v402_v11, %v397_v20 }
  0xfc   : > { %416 = vst.msk [vmem:[#allocation2 + $0x8] sm:$0xff] %vm411_vm1, %v403_v21  ;;  %v404_v25 = vadd.f32 %v402_v11, %v395_v22  ;;  %v1215_v26 = vpop.f32.mrb[4].mxu0  ;;  %v1271_v22 = vld [vmem:[%s1600_s3] sm:$0xff]  }
  0xfd   : > { %419 = vst.msk [vmem:[#allocation2 + $0x20] sm:$0xff] %vm411_vm1, %v406_v24  ;;  %v388_v27 = vadd.f32 %v1215_v26, %v1123_v7  ;;  %v379_v28 = vpop.f32.mrb[5].mxu0  ;;  %1217 = vmatprep.subr.bf16.mxu1 %v1271_v22 }
  0xfe   : > { %417 = vst.msk [vmem:[#allocation2 + $0x10] sm:$0xff] %vm411_vm1, %v404_v25  ;;  %v380_v29 = vadd.f32 %v1123_v7, %v379_v28  ;;  %v1216_v31 = vpop.f32.mrb[6].mxu0  ;;  %1218 = vmatpush3.bf16.msra.mxu1 %v1271_v22  ;;  %v1272_v28 = vld [vmem:[%s1600_s3 + $0x8] sm:$0xff]  }
  0xff   : > { %v400_v33 = vmax.f32 %v388_v27, 0.0  ;;  %v391_v34 = vadd.f32 %v1216_v31, %v1123_v7  ;;  %v382_v35 = vpop.f32.mrb[7].mxu0  ;;  %1219 = vmatprep.subr.bf16.mxu1 %v1272_v28 }
 0x100   : > { %v398_v36 = vmax.f32 %v380_v29, 0.0  ;;  %v383_v37 = vadd.f32 %v1123_v7, %v382_v35 }
 0x101   : > { %v409_v38 = vadd.f32 %v402_v11, %v400_v33  ;;  %v401_v40 = vmax.f32 %v391_v34, 0.0  ;;  %v1274_v34 = vld [vmem:[%s1600_s3 + $0x18] sm:$0xff]  }
 0x102   : > { %v407_v41 = vadd.f32 %v402_v11, %v398_v36  ;;  %v399_v42 = vmax.f32 %v383_v37, 0.0  ;;  %v532_v45 = vld [vmem:[#allocation2 + $0x18] sm:$0xff]  ;;  %1220 = vmatpush3.bf16.msra.mxu1 %v1272_v28 }
 0x103   : > { %422 = vst.msk [vmem:[#allocation2 + $0x38] sm:$0xff] %vm411_vm1, %v409_v38  ;;  %v433_v43 = vld [vmem:[#allocation2 + $0x8] sm:$0xff]  ;;  %v410_v46 = vadd.f32 %v402_v11, %v401_v40  ;;  %v540_v55 = vrot.slane %v532_v45, 7  ;;  %v606_v5 = vrot.slane %v532_v45, 1  ;;  %v1275_v38 = vld [vmem:[%s1600_s3 + $0x20] ss:$0 sps:$4 sm:$0xff]  }
 0x104   : > { %420 = vst.msk [vmem:[#allocation2 + $0x28] sm:$0xff] %vm411_vm1, %v407_v41  ;;  %v464_v47 = vpack.c.bf16 %v433_v43, %v432_v30  ;;  %v490_v48 = vrot.slane %v433_v43, 1  ;;  %v1393_v49 = vld [vmem:[#allocation2 + $0x20] sm:$0xff]  ;;  %v408_v50 = vadd.f32 %v402_v11, %v399_v42  ;;  %v441_v51 = vrot.slane %v433_v43, 7  ;;  %v1273_v30 = vld [vmem:[%s1600_s3 + $0x10] sm:$0xff]  }
 0x105   : > { %v580_v52 = vpack.c.bf16 %v1393_v49, %v532_v45  ;;  %423 = vst.msk [vmem:[#allocation2 + $0x40] sm:$0xff] %vm411_vm1, %v410_v46  ;;  %v434_v53 = vld [vmem:[#allocation2 + $0x10] sm:$0xff]  ;;  %v541_v56 = vrot.slane %v1393_v49, 7  ;;  %v607_v61 = vrot.slane %v1393_v49, 1  ;;  %v548_v0 = vsel %vm426_vm3, %v540_v55, 0.0  ;;  %1221 = vmatprep.subr.bf16.mxu1 %v1273_v30 }
 0x106   : > { %472 = vrot.lane.b32.xlu0 %v464_v47, %s1300_s19  ;;  %421 = vst.msk [vmem:[#allocation2 + $0x30] sm:$0xff] %vm411_vm1, %v408_v50  ;;  %v442_v57 = vrot.slane %v434_v53, 7  ;;  %v498_v58 = vsel %vm429_vm2, %v490_v48, 0.0  ;;  %v465_v60 = vpack.c.bf16 %v532_v45, %v434_v53  ;;  %v449_v63 = vsel %vm426_vm3, %v441_v51, 0.0  ;;  %1222 = vmatpush3.bf16.msra.mxu1 %v1273_v30  ;;  %v653_v45 = vld [vmem:[#allocation2 + $0x48] sm:$0xff] }
 0x107   : > { %589 = vrot.lane.b32.xlu1 %v580_v52, %s1301_s20  ;;  %v505_v62 = vpack.c.bf16 %v498_v58, %v497_v54  ;;  %v549_v1 = vsel %vm426_vm3, %v541_v56, 0.0  ;;  %v456_v2 = vpack.c.bf16 %v449_v63, %v448_v59  ;;  %v579_v6 = vpack.c.bf16 %v434_v53, %v433_v43  ;;  %1223 = vmatprep.subr.bf16.mxu1 %v1274_v34 }
 0x108   : > { %v450_v3 = vsel %vm426_vm3, %v442_v57, 0.0  ;;  %v555_v7 = vpack.c.bf16 %v549_v1, %v548_v0  ;;  %v1424_v8 = vsel %vm429_vm2, %v607_v61, 0.0  ;;  %v491_v9 = vrot.slane %v434_v53, 1 }
 0x109   : > { %v457_v4 = vpack.c.bf16 %v548_v0, %v450_v3  ;;  %460 = vst.msk [vmem:[#allocation3] sm:$0xff] %vm411_vm1, %v456_v2  ;;  %v614_v13 = vsel %vm429_vm2, %v606_v5, 0.0  ;;  %v554_v19 = vpack.c.bf16 %v450_v3, %v449_v63  ;;  %v817_v40 = vsel %vm815_vm4, %v1275_v38, 0 }
 0x10a   : > { %474 = vrot.lane.b32.xlu0 %v465_v60, %s1300_s19  ;;  %v1427_v11 = vld [vmem:[#allocation2 + $0x38] sm:$0xff]  ;;  %v621_v14 = vpack.c.bf16 %v1424_v8, %v614_v13  ;;  %v499_v16 = vsel %vm429_vm2, %v491_v9, 0.0  ;;  %1224 = vmatpush3.bf16.msra.mxu1 %v1274_v34  ;;  %v661_v50 = vrot.slane %v653_v45, 7  ;;  %v727_v59 = vrot.slane %v653_v45, 1 }
 0x10b   : > { %513 = vrot.lane.b32.xlu1 %v505_v62, %s1302_s21  ;;  %461 = vst.msk [vmem:[#allocation3 + $0x8] sm:$0xff] %vm411_vm1, %v457_v4  ;;  %v649_v10 = vld [vmem:[#allocation2 + $0x28] sm:$0xff]  ;;  %v447_v18 = vrot.slane %v1427_v11, 7  ;;  %v506_v20 = vpack.c.bf16 %v614_v13, %v499_v16  ;;  %v620_v27 = vpack.c.bf16 %v499_v16, %v498_v58  ;;  %1245 = vmatprep.subr.msk.bf16.mxu1 %vm815_vm4, %v1275_v38  ;;  %v610_v43 = vrot.slane %v1427_v11, 1 }
 0x10c   : > { %v445_v15 = vrot.slane %v649_v10, 7  ;;  %v696_v29 = vpack.c.bf16 %v649_v10, %v1393_v49  ;;  %v537_v31 = vld [vmem:[#allocation2 + $0x40] sm:$0xff]  ;;  %v723_v37 = vrot.slane %v649_v10, 1  ;;  %v669_v53 = vsel %vm426_vm3, %v661_v50, 0.0 }
 0x10d   : > { %v1429_v12 = vld [vmem:[#allocation2 + $0x30] sm:$0xff]  ;;  %v455_v25 = vsel %vm426_vm3, %v447_v18, 0.0  ;;  %v582_v33 = vpack.c.bf16 %v537_v31, %v1427_v11  ;;  %v545_v39 = vrot.slane %v537_v31, 7  ;;  %v611_v44 = vrot.slane %v537_v31, 1 }
 0x10e   : > { %587 = vrot.lane.b32.xlu0 %v579_v6, %s1301_s20  ;;  %v446_v17 = vrot.slane %v1429_v12, 7  ;;  %v1442_v21 = vsel %vm426_vm3, %v445_v15, 0.0  ;;  %v581_v35 = vpack.c.bf16 %v1429_v12, %v649_v10  ;;  %v467_v36 = vpack.c.bf16 %v1427_v11, %v1429_v12  ;;  %1226 = vmatpush3.bf16.msra.mxu1 %v817_v40 }
 0x10f   : > { %564 = vrot.lane.b32.xlu1 %v555_v7, %s1303_s22  ;;  %v458_v23 = vpack.c.bf16 %v1442_v21, %v549_v1  ;;  %v731_v41 = vsel %vm429_vm2, %v723_v37, 0.0  ;;  %v553_v42 = vsel %vm426_vm3, %v545_v39, 0.0  ;;  %v618_v48 = vsel %vm429_vm2, %v610_v43, 0.0 }
 0x110   : > { %v454_v24 = vsel %vm426_vm3, %v446_v17, 0.0  ;;  %v737_v46 = vpack.c.bf16 %v731_v41, %v1424_v8  ;;  %v557_v47 = vpack.c.bf16 %v553_v42, %v455_v25  ;;  %v619_v49 = vsel %vm429_vm2, %v611_v44, 0.0 }
 0x111   : > { %v1454_v26 = vpack.c.bf16 %v455_v25, %v454_v24  ;;  %462 = vst.msk [vmem:[#allocation3 + $0x10] sm:$0xff] %vm411_vm1, %v458_v23  ;;  %v623_v51 = vpack.c.bf16 %v619_v49, %v618_v48  ;;  %v609_v52 = vrot.slane %v1429_v12, 1  ;;  %v556_v54 = vpack.c.bf16 %v454_v24, %v1442_v21 }
 0x112   : > { %703 = vrot.lane.b32.xlu0 %v465_v60, %s1304_s23  ;;  %v673_v55 = vpack.c.bf16 %v669_v53, %v553_v42  ;;  %v698_v60 = vpack.c.bf16 %v653_v45, %v537_v31  ;;  %v735_v61 = vsel %vm429_vm2, %v727_v59, 0.0 }
 0x113   : > { %630 = vrot.lane.b32.xlu1 %v621_v14, %s1305_s24  ;;  %463 = vst.msk [vmem:[#allocation3 + $0x18] sm:$0xff] %vm411_vm1, %v1454_v26  ;;  %v617_v56 = vsel %vm429_vm2, %v609_v52, 0.0  ;;  %v739_v62 = vpack.c.bf16 %v735_v61, %v619_v49 }
 0x114   : > { %v622_v57 = vpack.c.bf16 %v617_v56, %v731_v41  ;;  %v508_v58 = vpack.c.bf16 %v618_v48, %v617_v56 }
 0x116   : > { %562 = vrot.lane.b32.xlu0 %v554_v19, %s1303_s22 }
 0x117   : > { %515 = vrot.lane.b32.xlu1 %v506_v20, %s1302_s21 }
 0x11a   : > { %628 = vrot.lane.b32.xlu0 %v620_v27, %s1305_s24 }
 0x11b   : > { %705 = vrot.lane.b32.xlu1 %v696_v29, %s1304_s23 }
 0x11e   : > { %678 = vrot.lane.b32.xlu0 %v457_v4, %s1306_s8 }
 0x11f   : > { %476 = vrot.lane.b32.xlu1 %v696_v29, %s1300_s19 }
 0x122   : > { %744 = vrot.lane.b32.xlu0 %v506_v20, %s1307_s13 }
 0x123   : > { %593 = vrot.lane.b32.xlu1 %v582_v33, %s1301_s20 }
 0x126   : > { %591 = vrot.lane.b32.xlu0 %v581_v35, %s1301_s20  ;;  %v896_v35 = vld [vmem:[%s1601_s4] sm:$0xf] }
 0x127   : > { %478 = vrot.lane.b32.xlu1 %v467_v36, %s1300_s19  ;;  %1246 = vmatprep.subr.msk.bf16.mxu0 %vm815_vm4, %v896_v35  ;;  %s1122_s19 = sld [smem:[#allocation5 + $0x1]] }
 0x12a   : > { %707 = vrot.lane.b32.xlu0 %v467_v36, %s1304_s23  ;;  %v933_v36 = vsel %vm815_vm4, %v896_v35, 0 }
 0x12b   : > { %680 = vrot.lane.b32.xlu1 %v458_v23, %s1306_s8  ;;  %1236 = vmatpush3.bf16.msra.mxu0 %v933_v36 }
 0x12d   : > { %v774_v37 = vstv %s1122_s19 }
 0x12e   : > { %746 = vrot.lane.b32.xlu0 %v737_v46, %s1307_s13 }
 0x12f   : > { %568 = vrot.lane.b32.xlu1 %v557_v47, %s1303_s22 }
 0x132   : > { %517 = vrot.lane.b32.xlu0 %v737_v46, %s1302_s21 }
 0x133   : > { %634 = vrot.lane.b32.xlu1 %v623_v51, %s1305_s24 }
 0x136   : > { %566 = vrot.lane.b32.xlu0 %v556_v54, %s1303_s22 }
 0x137   : > { %684 = vrot.lane.b32.xlu1 %v673_v55, %s1306_s8 }
 0x13a   : > { %632 = vrot.lane.b32.xlu0 %v622_v57, %s1305_s24  ;;  %s1574_s24 = scalar_lea.vmem %s1604_s7, %s1119_s12 }
 0x13b   : > { %519 = vrot.lane.b32.xlu1 %v508_v58, %s1302_s21 }
 0x13e   : > { %682 = vrot.lane.b32.xlu0 %v1454_v26, %s1306_s8 }
 0x13f   : > { %709 = vrot.lane.b32.xlu1 %v698_v60, %s1304_s23 }
 0x142   : > { %748 = vrot.lane.b32.xlu0 %v508_v58, %s1307_s13 }
 0x143   : > { %750 = vrot.lane.b32.xlu1 %v739_v62, %s1307_s13 }
 0x178   : > { %v473_v63 = vpop.permute.xlu0 %472 }
 0x179   : > { %485 = vst.msk [vmem:[#allocation3] sm:$0xff] %vm484_vm5, %v473_v63  ;;  %v590_v0 = vpop.permute.xlu1 %589 }
 0x17c   : > { %v475_v1 = vpop.permute.xlu0 %474 }
 0x17d   : > { %486 = vst.msk [vmem:[#allocation3 + $0x8] sm:$0xff] %vm484_vm5, %v475_v1  ;;  %v514_v2 = vpop.permute.xlu1 %513 }
 0x17e   : > { %526 = vst.msk [vmem:[#allocation3] sm:$0xff] %vm525_vm6, %v514_v2  ;;  %v1182_v2 = vld [vmem:[%s1373_s15 + $0x8] sm:$0xff]  }
 0x180   : > { %v588_v32 = vpop.permute.xlu0 %587 }
 0x181   : > { %v565_v3 = vpop.permute.xlu1 %564 }
 0x184   : > { %v704_v4 = vpop.permute.xlu0 %703 }
 0x185   : > { %v631_v5 = vpop.permute.xlu1 %630 }
 0x188   : > { %v563_v6 = vpop.permute.xlu0 %562 }
 0x189   : > { %575 = vst.msk [vmem:[#allocation3] sm:$0xff] %vm574_vm7, %v563_v6  ;;  %v516_v7 = vpop.permute.xlu1 %515 }
 0x18a   : > { %527 = vst.msk [vmem:[#allocation3 + $0x8] sm:$0xff] %vm525_vm6, %v516_v7 }
 0x18b   : > { %600 = vst.msk [vmem:[#allocation3] sm:$0xff] %vm599_vm8, %v588_v32  ;;  %v1167_v32 = vld [vmem:[%s1373_s15] sm:$0xff]  }
 0x18c   : > { %576 = vst.msk [vmem:[#allocation3 + $0x8] sm:$0xff] %vm574_vm7, %v565_v3  ;;  %v629_v8 = vpop.permute.xlu0 %628  ;;  %v1143_v3 = vld [vmem:[%s1603_s6] ss:$0 sm:$0xff]  ;;  %v1168_v6 = vunpack.c.l.bf16 %v1167_v32 }
 0x18d   : > { %601 = vst.msk [vmem:[#allocation3 + $0x8] sm:$0xff] %vm599_vm8, %v590_v0  ;;  %v706_v9 = vpop.permute.xlu1 %705 }
 0x18e   : > { %641 = vst.msk [vmem:[#allocation3] sm:$0xff] %vm640_vm9, %v629_v8  ;;  %642 = vst.msk [vmem:[#allocation3 + $0x8] sm:$0xff] %vm640_vm9, %v631_v5 }
 0x190   : > { %v679_v10 = vpop.permute.xlu0 %678 }
 0x191   : > { %691 = vst.msk [vmem:[#allocation3] sm:$0xff] %vm690_vm10, %v679_v10  ;;  %v477_v11 = vpop.permute.xlu1 %476 }
 0x192   : > { %487 = vst.msk [vmem:[#allocation3 + $0x10] sm:$0xff] %vm484_vm5, %v477_v11 }
 0x193   : > { %716 = vst.msk [vmem:[#allocation3] sm:$0xff] %vm715_vm11, %v704_v4  ;;  %v1172_v4 = vunpack.c.l.bf16 %v1182_v2 }
 0x194   : > { %v745_v12 = vpop.permute.xlu0 %744 }
 0x195   : > { %757 = vst.msk [vmem:[#allocation3] sm:$0xff] %vm756_vm12, %v745_v12  ;;  %v594_v13 = vpop.permute.xlu1 %593  ;;  %v1169_v12 = vunpack.c.h.bf16 %v1167_v32 }
 0x198   : > { %v592_v14 = vpop.permute.xlu0 %591 }
 0x199   : > { %v479_v15 = vpop.permute.xlu1 %478 }
 0x19a   : > { %488 = vst.msk [vmem:[#allocation3 + $0x18] sm:$0xff] %vm484_vm5, %v479_v15 }
 0x19c   : > { %v708_v16 = vpop.permute.xlu0 %707  ;;  %v761_v17 = vld [vmem:[#allocation3] sm:$0xff] }
 0x19d   : > { %v681_v18 = vpop.permute.xlu1 %680  ;;  %1227 = vmatprep.mubr.msk.bf16.mxu1 %vm802_vm13, %v761_v17 }
 0x19e   : > { %692 = vst.msk [vmem:[#allocation3 + $0x8] sm:$0xff] %vm690_vm10, %v681_v18 }
 0x19f   : > { %717 = vst.msk [vmem:[#allocation3 + $0x8] sm:$0xff] %vm715_vm11, %v706_v9  ;;  %v1173_v9 = vunpack.c.h.bf16 %v1182_v2 }
 0x1a0   : > { %v747_v19 = vpop.permute.xlu0 %746 }
 0x1a1   : > { %758 = vst.msk [vmem:[#allocation3 + $0x8] sm:$0xff] %vm756_vm12, %v747_v19  ;;  %v569_v20 = vpop.permute.xlu1 %568 }
 0x1a4   : > { %v518_v21 = vpop.permute.xlu0 %517 }
 0x1a5   : > { %528 = vst.msk [vmem:[#allocation3 + $0x10] sm:$0xff] %vm525_vm6, %v518_v21  ;;  %v635_v22 = vpop.permute.xlu1 %634 }
 0x1a8   : > { %v567_v23 = vpop.permute.xlu0 %566  ;;  %v762_v24 = vld [vmem:[#allocation3 + $0x8] sm:$0xff] }
 0x1a9   : > { %577 = vst.msk [vmem:[#allocation3 + $0x10] sm:$0xff] %vm574_vm7, %v567_v23  ;;  %v685_v25 = vpop.permute.xlu1 %684  ;;  %1228 = vmatmul.mubr.msk.bf16.vlgmr.msra.gmra.mrb[0].mxu1 %vm802_vm13, %v762_v24 }
 0x1aa   : > { %602 = vst.msk [vmem:[#allocation3 + $0x10] sm:$0xff] %vm599_vm8, %v592_v14 }
 0x1ac   : > { %v633_v26 = vpop.permute.xlu0 %632 }
 0x1ad   : > { %643 = vst.msk [vmem:[#allocation3 + $0x10] sm:$0xff] %vm640_vm9, %v633_v26  ;;  %v520_v27 = vpop.permute.xlu1 %519 }
 0x1ae   : > { %529 = vst.msk [vmem:[#allocation3 + $0x18] sm:$0xff] %vm525_vm6, %v520_v27 }
 0x1af   : > { %578 = vst.msk [vmem:[#allocation3 + $0x18] sm:$0xff] %vm574_vm7, %v569_v20 }
 0x1b0   : > { %603 = vst.msk [vmem:[#allocation3 + $0x18] sm:$0xff] %vm599_vm8, %v594_v13  ;;  %v683_v28 = vpop.permute.xlu0 %682 }
 0x1b1   : > { %644 = vst.msk [vmem:[#allocation3 + $0x18] sm:$0xff] %vm640_vm9, %v635_v22  ;;  %v710_v29 = vpop.permute.xlu1 %709 }
 0x1b2   : > { %693 = vst.msk [vmem:[#allocation3 + $0x10] sm:$0xff] %vm690_vm10, %v683_v28  ;;  %694 = vst.msk [vmem:[#allocation3 + $0x18] sm:$0xff] %vm690_vm10, %v685_v25  ;;  %v1184_v28 = vld [vmem:[%s1373_s15 + $0x18] sm:$0xff]  }
 0x1b3   : > { %718 = vst.msk [vmem:[#allocation3 + $0x10] sm:$0xff] %vm715_vm11, %v708_v16  ;;  %719 = vst.msk [vmem:[#allocation3 + $0x18] sm:$0xff] %vm715_vm11, %v710_v29  ;;  %v1183_v29 = vld [vmem:[%s1373_s15 + $0x10] sm:$0xff]   ;;  %v1181_v36 = vunpack.c.h.bf16 %v1184_v28 }
 0x1b4   : > { %v749_v30 = vpop.permute.xlu0 %748 }
 0x1b5   : > { %759 = vst.msk [vmem:[#allocation3 + $0x10] sm:$0xff] %vm756_vm12, %v749_v30  ;;  %v751_v31 = vpop.permute.xlu1 %750  ;;  %v1180_v30 = vunpack.c.l.bf16 %v1184_v28 }
 0x1b6   : > { %760 = vst.msk [vmem:[#allocation3 + $0x18] sm:$0xff] %vm756_vm12, %v751_v31 }
 0x1bc   : > { %v763_v33 = vld [vmem:[#allocation3 + $0x10] sm:$0xff] }
 0x1bd   : > { %1231 = vmatprep.mubr.msk.bf16.mxu1 %vm802_vm13, %v763_v33  ;;  %v764_v34 = vld [vmem:[#allocation3 + $0x18] sm:$0xff]  ;;  %v1176_v33 = vunpack.c.l.bf16 %v1183_v29 }
 0x1be   : > { %1232 = vmatmul.mubr.msk.bf16.gmra.mrb[4].mxu1 %vm802_vm13, %v764_v34 }
 0x27c   : > { %v1229_v38 = vpop.f32.mrb[0].mxu1 }
 0x27d   : > { %v862_v39 = vadd.f32 %v1229_v38, %v774_v37  ;;  %v853_v40 = vpop.f32.mrb[1].mxu1 }
 0x27e   : > { %v854_v41 = vadd.f32 %v853_v40, %v774_v37  ;;  %v1230_v42 = vpop.f32.mrb[2].mxu1 }
 0x27f   : > { %v865_v43 = vadd.f32 %v1230_v42, %v774_v37  ;;  %v856_v44 = vpop.f32.mrb[3].mxu1  ;;  %v886_v46 = vmax.f32 %v862_v39, 0.0  ;;  %v1177_v39 = vunpack.c.h.bf16 %v1183_v29 }
 0x280   : > { %v857_v45 = vadd.f32 %v856_v44, %v774_v37  ;;  %v884_v48 = vmax.f32 %v854_v41, 0.0 }
 0x281   : > { %v887_v47 = vmax.f32 %v865_v43, 0.0 }
 0x282   : > { %v885_v49 = vmax.f32 %v857_v45, 0.0 }
 0x283   : > { %v893_v50 = vpack.c.bf16 %v887_v47, %v886_v46 }
 0x284   : > { %v892_v51 = vpack.c.bf16 %v885_v49, %v884_v48 }
 0x286   : > { %1237 = vmatprep.mubr.msk.bf16.mxu0 %vm411_vm1, %v892_v51 }
 0x287   : > { %1238 = vmatmul.mubr.msk.bf16.vlgmr.msra.gmra.mrb[8].mxu0 %vm411_vm1, %v893_v50 }
 0x291   : > { %v1233_v52 = vpop.f32.mrb[4].mxu1 }
 0x292   : > { %v878_v53 = vadd.f32 %v1233_v52, %v774_v37  ;;  %v869_v54 = vpop.f32.mrb[5].mxu1 }
 0x293   : > { %v870_v55 = vadd.f32 %v869_v54, %v774_v37  ;;  %v1234_v56 = vpop.f32.mrb[6].mxu1 }
 0x294   : > { %v881_v57 = vadd.f32 %v1234_v56, %v774_v37  ;;  %v872_v58 = vpop.f32.mrb[7].mxu1  ;;  %v890_v60 = vmax.f32 %v878_v53, 0.0 }
 0x295   : > { %v873_v59 = vadd.f32 %v872_v58, %v774_v37  ;;  %v888_v62 = vmax.f32 %v870_v55, 0.0 }
 0x296   : > { %v891_v61 = vmax.f32 %v881_v57, 0.0 }
 0x297   : > { %v889_v63 = vmax.f32 %v873_v59, 0.0 }
 0x298   : > { %v895_v0 = vpack.c.bf16 %v891_v61, %v890_v60 }
 0x299   : > { %v894_v1 = vpack.c.bf16 %v889_v63, %v888_v62 }
 0x29b   : > { %1241 = vmatprep.mubr.msk.bf16.mxu0 %vm411_vm1, %v894_v1 }
 0x29c   : > { %1242 = vmatmul.mubr.msk.bf16.gmra.mrb[12].mxu0 %vm411_vm1, %v895_v0 }
 0x35a   : > { %v1239_v5 = vpop.f32.mrb[8].mxu0 }
 0x35b   : > { %v978_v7 = vadd.f32 %v1239_v5, %v1143_v3  ;;  %v969_v8 = vpop.f32.mrb[9].mxu0 }
 0x35c   : > { %v970_v10 = vadd.f32 %v1143_v3, %v969_v8  ;;  %v1240_v11 = vpop.f32.mrb[10].mxu0 }
 0x35d   : > { %v1002_v13 = vadd.f32 %v1172_v4, %v978_v7  ;;  %v981_v14 = vadd.f32 %v1240_v11, %v1143_v3  ;;  %v972_v15 = vpop.f32.mrb[11].mxu0 }
 0x35e   : > { %v1000_v16 = vadd.f32 %v1168_v6, %v970_v10  ;;  %v973_v17 = vadd.f32 %v1143_v3, %v972_v15 }
 0x35f   : > { %v1010_v18 = vmax.f32 %v1002_v13, 0.0  ;;  %v1003_v19 = vadd.f32 %v1173_v9, %v981_v14 }
 0x360   : > { %v1008_v20 = vmax.f32 %v1000_v16, 0.0  ;;  %v1001_v21 = vadd.f32 %v1169_v12, %v973_v17 }
 0x361   : > { %v1160_v22 = vpack.c.bf16 %v1010_v18, %v1010_v18  ;;  %v1011_v23 = vmax.f32 %v1003_v19, 0.0 }
 0x362   : > { %v1158_v24 = vpack.c.bf16 %v1008_v20, %v1008_v20  ;;  %v1009_v25 = vmax.f32 %v1001_v21, 0.0 }
 0x363   : > { %1051 = vst.msk [vmem:[%s1574_s24 + $0x8] sm:$0xf] %vm1048_vm14, %v1160_v22  ;;  %v1161_v26 = vpack.c.bf16 %v1011_v23, %v1011_v23 }
 0x364   : > { %1049 = vst.msk [vmem:[%s1574_s24] sm:$0xf] %vm1048_vm14, %v1158_v24  ;;  %v1159_v27 = vpack.c.bf16 %v1009_v25, %v1009_v25 }
 0x365   : > { %1052 = vst.msk [vmem:[%s1574_s24 + $0xc] sm:$0xf] %vm1048_vm14, %v1161_v26 }
 0x366   : > { %1050 = vst.msk [vmem:[%s1574_s24 + $0x4] sm:$0xf] %vm1048_vm14, %v1159_v27 }
 0x36f   : > { %v1243_v31 = vpop.f32.mrb[12].mxu0 }
 0x370   : > { %v994_v34 = vadd.f32 %v1243_v31, %v1143_v3  ;;  %v985_v35 = vpop.f32.mrb[13].mxu0 }
 0x371   : > { %v986_v37 = vadd.f32 %v1143_v3, %v985_v35  ;;  %v1244_v38 = vpop.f32.mrb[14].mxu0 }
 0x372   : > { %v1006_v40 = vadd.f32 %v1180_v30, %v994_v34  ;;  %v997_v41 = vadd.f32 %v1244_v38, %v1143_v3  ;;  %v988_v42 = vpop.f32.mrb[15].mxu0 }
 0x373   : > { %v1004_v43 = vadd.f32 %v1176_v33, %v986_v37  ;;  %v989_v44 = vadd.f32 %v1143_v3, %v988_v42 }
 0x374   : > { %v1014_v45 = vmax.f32 %v1006_v40, 0.0  ;;  %v1007_v46 = vadd.f32 %v1181_v36, %v997_v41 }
 0x375   : > { %v1012_v47 = vmax.f32 %v1004_v43, 0.0  ;;  %v1005_v48 = vadd.f32 %v1177_v39, %v989_v44 }
 0x376   : > { %v1164_v49 = vpack.c.bf16 %v1014_v45, %v1014_v45  ;;  %v1015_v50 = vmax.f32 %v1007_v46, 0.0 }
 0x377   : > { %v1162_v51 = vpack.c.bf16 %v1012_v47, %v1012_v47  ;;  %v1013_v52 = vmax.f32 %v1005_v48, 0.0 }
 0x378   : > { %1055 = vst.msk [vmem:[%s1574_s24 + $0x18] sm:$0xf] %vm1048_vm14, %v1164_v49  ;;  %v1165_v53 = vpack.c.bf16 %v1015_v50, %v1015_v50 }
 0x379   : > { %1053 = vst.msk [vmem:[%s1574_s24 + $0x10] sm:$0xf] %vm1048_vm14, %v1162_v51  ;;  %v1163_v54 = vpack.c.bf16 %v1013_v52, %v1013_v52 }
 0x37a   : > { %1056 = vst.msk [vmem:[%s1574_s24 + $0x1c] sm:$0xf] %vm1048_vm14, %v1165_v53 }
 0x37b   : > { %1054 = vst.msk [vmem:[%s1574_s24 + $0x14] sm:$0xf] %vm1048_vm14, %v1163_v54 }
 0x37c PF: > { %s23_s29 = sadd.s32 1, %s1296_s29  }
 0x37d   : > { %p20_p9 = scmp.ge.s32.totalorder %s23_s29, 4  }
 0x37f   :  { %22 = sbr.rel (!%p20_p9) target bundleno = 16 (0x10), region = 77 }

// kernel: tpu_custom_call.1
= control target key start
LH: loop header
LB: loop body
LE: loop exit
PB: predicated region body
PF: predicated region fallthrough
CT: control target
= control target key end

     0   :  { %s1597_s0 = inlined_call_operand.vmem [shape: f32[2], index: 0, kind: input, shape index: {}]   ;;  %s1598_s1 = inlined_call_operand.vmem [shape: bf16[128,32], index: 1, kind: input, shape index: {}]   ;;  %s1599_s2 = inlined_call_operand.vmem [shape: bf16[32,8], index: 2, kind: input, shape index: {}]   ;;  %s1600_s3 = inlined_call_operand.vmem [shape: bf16[72,8], index: 3, kind: input, shape index: {}]   ;;  %s1601_s4 = inlined_call_operand.vmem [shape: bf16[8,32], index: 4, kind: input, shape index: {}]   ;;  %s1602_s5 = inlined_call_operand.vmem [shape: f32[1,8], index: 5, kind: input, shape index: {}]   ;;  %s1603_s6 = inlined_call_operand.vmem [shape: f32[1,32], index: 6, kind: input, shape index: {}]   ;;  %s1604_s7 = inlined_call_operand.vmem [shape: bf16[128,32], index: 7, kind: output, shape index: {}]  }
   0x1   :  { %s12_s26 = sshll.u32 %s1597_s0, 4  ;;  %s13_s26 = int_to_ptr.vmem [resolvable:$true] %s12_s26 }
   0x2   :  { %s1276_s27 = scalar_lea.vmem %s13_s26, 16  ;;  %p1281_p1 = scmp.lt.s32.totalorder %s13_s26, %s13_s26 }
   0x3   :  { %p1277_p0 = scmp.ne.s32.totalorder %s13_s26, %s1276_s27  ;;  %p1282_p2 = scmp.lt.s32.totalorder %s1276_s27, %s1276_s27 }
   0x5   :  { %p1283_p3 = por %p1282_p2, %p1281_p1 }
   0x7   :  { %p1284_p4 = pnand %p1283_p3, %p1277_p0 }
   0x9   :  { %1287 = shalt.err (!%p1284_p4)  }
   0xa   :  { %s1298_s28 = smov [#allocation5]  }
   0xb   :  { %15 = dma.vmem_to_smem %s13_s26, 16, %s1298_s28, [#allocation4] }
   0xc   :  { %1292 = dma.done.wait [#allocation4], 16 }
   0xd   :  { %1293 = vsyncadd [#allocation4], 4294967280 }
   0xe   :  { %17 = sfence }
   0xf   :  { %s1351_s29 = smov 0  }
  0x10 LB: > { %s1113_s0 = sadd.s32 4294967295, %s1296_s29   ;;  %p1117_p5 = scmp.ge.s32.totalorder %s1296_s29, 1  ;;  %s1296_s29 = sphi %s1351_s29, %s23_s29  }
  0x11   : > { %p220_p6 = scmp.lt.s32.totalorder %s1296_s29, 3 }
  0x13   : > { %p221_p7 = pnand %p1117_p5, %p220_p6 }
  0x14   : > { %v1265_v0 = vld [vmem:[%s1599_s2] sm:$0xff] (!%p221_p7)   ;;  %s1118_s9 = sshll.u32 (!%p221_p7), %s1113_s0, 3  ;;  %v1266_v1 = vld [vmem:[%s1599_s2 + $0x8] sm:$0xff] (!%p221_p7)   ;;  %vm316_vm0 = vcmask (!%p221_p7), 261120   ;;  %vm411_vm1 = vcmask (!%p221_p7), 64512   ;;  %v1299_v6 = vmov (!%p221_p7), 0.0   ;;  %v424_v23 = vlaneseq (!%p221_p7) }
  0x15   : > { %224 = sbr.rel (%p221_p7) target bundleno = 892 (0x37c), region = 44  ;;  %p251_p8 = scmp.lt.s32.totalorder (!%p221_p7), %s1118_s9, 15  ;;  %1205 = vmatprep.subr.bf16.mxu0 (!%p221_p7), %v1265_v0  ;;  %412 = vst.msk [vmem:[#allocation2] sm:$0xff] (!%p221_p7), %vm411_vm1, %v1299_v6  ;;  %414 = vst.msk [vmem:[#allocation2 + $0x48] sm:$0xff] (!%p221_p7), %vm411_vm1, %v1299_v6  ;;  %v1123_v7 = vld [vmem:[%s1602_s5] ss:$0 sm:$0xff] (!%p221_p7) }
  0x16   : > { %1206 = vmatpush3.bf16.msra.mxu0 (!%p221_p7), %v1265_v0  ;;  %s263_s16 = sld [smem:[#allocation5]] (!%p221_p7)  ;;  %v1388_v32 = vshrl.u32 (!%p221_p7), %v424_v23, 7  ;;  %s1300_s19 = smov (!%p221_p7), 8   ;;  %vm815_vm4 = vcmask (!%p221_p7), 1043456   ;;  %vm484_vm5 = vcmask (!%p221_p7), 130112   ;;  %vm525_vm6 = vcmask (!%p221_p7), 195712  }
  0x17   : > { %1207 = vmatprep.subr.bf16.mxu0 (!%p221_p7), %v1266_v1  ;;  %s1301_s20 = smov (!%p221_p7), 32   ;;  %s1302_s21 = smov (!%p221_p7), 16   ;;  %vm574_vm7 = vcmask (!%p221_p7), 261312   ;;  %vm599_vm8 = vcmask (!%p221_p7), 326912   ;;  %vm640_vm9 = vcmask (!%p221_p7), 392512   ;;  %vm690_vm10 = vcmask (!%p221_p7), 458112  }
  0x18   : > { %vm429_vm2 = vcmp.le.s32.totalorder (!%p221_p7), %v1388_v32, 6  ;;  %vm426_vm3 = vcmp.ge.s32.totalorder (!%p221_p7), %v1388_v32, 1  ;;  %s1303_s22 = smov (!%p221_p7), 24   ;;  %s1304_s23 = smov (!%p221_p7), 56   ;;  %vm715_vm11 = vcmask (!%p221_p7), 523712   ;;  %vm756_vm12 = vcmask (!%p221_p7), 589312  }
  0x19   : > { %s1305_s24 = smov (!%p221_p7), 40   ;;  %s1306_s8 = smov (!%p221_p7), 48   ;;  %vm802_vm13 = vcmask (!%p221_p7), 588800   ;;  %vm1048_vm14 = vcmask (!%p221_p7), 257024  }
  0x1a   : > { %1208 = vmatpush3.bf16.msra.mxu0 (!%p221_p7), %v1266_v1  ;;  %s1307_s13 = smov (!%p221_p7), 64  }
  0x1c   : > { %s1606_s9 = smov (!%p251_p8, %s1118_s9), 15  ;;  %v402_v11 = vstv %s263_s16  ;;  %v432_v30 = vld [vmem:[#allocation2] sm:$0xff] }
  0x1d   : > { %s1119_s12 = sshll.u32 %s1606_s9, 2  ;;  %v489_v39 = vrot.slane %v432_v30, 1  ;;  %v440_v44 = vrot.slane %v432_v30, 7 }
  0x1e   : > { %s1373_s15 = scalar_lea.vmem %s1598_s1, %s1119_s12 }
  0x1f   : > { %v1267_v2 = vld [vmem:[%s1373_s15] sm:$0xff]   ;;  %v1268_v3 = vld [vmem:[%s1373_s15 + $0x8] sm:$0xff]   ;;  %v1269_v4 = vld [vmem:[%s1373_s15 + $0x10] sm:$0xff]   ;;  %v497_v54 = vsel %vm429_vm2, %v489_v39, 0.0  ;;  %v448_v59 = vsel %vm426_vm3, %v440_v44, 0.0 }
  0x20   : > { %1209 = vmatprep.mubr.msk.bf16.mxu0 %vm316_vm0, %v1267_v2  ;;  %v1270_v5 = vld [vmem:[%s1373_s15 + $0x18] sm:$0xff]  }
  0x21   : > { %1210 = vmatmul.mubr.msk.bf16.vlgmr.msra.gmra.mrb[0].mxu0 %vm316_vm0, %v1268_v3 }
  0x22   : > { %1213 = vmatprep.mubr.msk.bf16.mxu0 %vm316_vm0, %v1269_v4 }
  0x29   : > { %1214 = vmatmul.mubr.msk.bf16.gmra.mrb[4].mxu0 %vm316_vm0, %v1270_v5 }
  0xf4   : > { %v1211_v8 = vpop.f32.mrb[0].mxu0 }
  0xf5   : > { %v372_v9 = vadd.f32 %v1211_v8, %v1123_v7  ;;  %v363_v10 = vpop.f32.mrb[1].mxu0 }
  0xf6   : > { %v364_v12 = vadd.f32 %v1123_v7, %v363_v10  ;;  %v1212_v13 = vpop.f32.mrb[2].mxu0 }
  0xf7   : > { %v396_v14 = vmax.f32 %v372_v9, 0.0  ;;  %v375_v15 = vadd.f32 %v1212_v13, %v1123_v7  ;;  %v366_v16 = vpop.f32.mrb[3].mxu0 }
  0xf8   : > { %v394_v17 = vmax.f32 %v364_v12, 0.0  ;;  %v367_v18 = vadd.f32 %v1123_v7, %v366_v16 }
  0xf9   : > { %v405_v19 = vadd.f32 %v402_v11, %v396_v14  ;;  %v397_v20 = vmax.f32 %v375_v15, 0.0 }
  0xfa   : > { %v403_v21 = vadd.f32 %v402_v11, %v394_v17  ;;  %v395_v22 = vmax.f32 %v367_v18, 0.0 }
  0xfb   : > { %418 = vst.msk [vmem:[#allocation2 + $0x18] sm:$0xff] %vm411_vm1, %v405_v19  ;;  %v406_v24 = vadd.f32 %v402_v11, %v397_v20 }
  0xfc   : > { %416 = vst.msk [vmem:[#allocation2 + $0x8] sm:$0xff] %vm411_vm1, %v403_v21  ;;  %v404_v25 = vadd.f32 %v402_v11, %v395_v22  ;;  %v1215_v26 = vpop.f32.mrb[4].mxu0  ;;  %v1271_v22 = vld [vmem:[%s1600_s3] sm:$0xff]  }
  0xfd   : > { %419 = vst.msk [vmem:[#allocation2 + $0x20] sm:$0xff] %vm411_vm1, %v406_v24  ;;  %v388_v27 = vadd.f32 %v1215_v26, %v1123_v7  ;;  %v379_v28 = vpop.f32.mrb[5].mxu0  ;;  %1217 = vmatprep.subr.bf16.mxu1 %v1271_v22 }
  0xfe   : > { %417 = vst.msk [vmem:[#allocation2 + $0x10] sm:$0xff] %vm411_vm1, %v404_v25  ;;  %v380_v29 = vadd.f32 %v1123_v7, %v379_v28  ;;  %v1216_v31 = vpop.f32.mrb[6].mxu0  ;;  %1218 = vmatpush3.bf16.msra.mxu1 %v1271_v22  ;;  %v1272_v28 = vld [vmem:[%s1600_s3 + $0x8] sm:$0xff]  }
  0xff   : > { %v400_v33 = vmax.f32 %v388_v27, 0.0  ;;  %v391_v34 = vadd.f32 %v1216_v31, %v1123_v7  ;;  %v382_v35 = vpop.f32.mrb[7].mxu0  ;;  %1219 = vmatprep.subr.bf16.mxu1 %v1272_v28 }
 0x100   : > { %v398_v36 = vmax.f32 %v380_v29, 0.0  ;;  %v383_v37 = vadd.f32 %v1123_v7, %v382_v35 }
 0x101   : > { %v409_v38 = vadd.f32 %v402_v11, %v400_v33  ;;  %v401_v40 = vmax.f32 %v391_v34, 0.0  ;;  %v1274_v34 = vld [vmem:[%s1600_s3 + $0x18] sm:$0xff]  }
 0x102   : > { %v407_v41 = vadd.f32 %v402_v11, %v398_v36  ;;  %v399_v42 = vmax.f32 %v383_v37, 0.0  ;;  %v532_v45 = vld [vmem:[#allocation2 + $0x18] sm:$0xff]  ;;  %1220 = vmatpush3.bf16.msra.mxu1 %v1272_v28 }
 0x103   : > { %422 = vst.msk [vmem:[#allocation2 + $0x38] sm:$0xff] %vm411_vm1, %v409_v38  ;;  %v433_v43 = vld [vmem:[#allocation2 + $0x8] sm:$0xff]  ;;  %v410_v46 = vadd.f32 %v402_v11, %v401_v40  ;;  %v540_v55 = vrot.slane %v532_v45, 7  ;;  %v606_v5 = vrot.slane %v532_v45, 1  ;;  %v1275_v38 = vld [vmem:[%s1600_s3 + $0x20] ss:$0 sps:$4 sm:$0xff]  }
 0x104   : > { %420 = vst.msk [vmem:[#allocation2 + $0x28] sm:$0xff] %vm411_vm1, %v407_v41  ;;  %v464_v47 = vpack.c.bf16 %v433_v43, %v432_v30  ;;  %v490_v48 = vrot.slane %v433_v43, 1  ;;  %v1393_v49 = vld [vmem:[#allocation2 + $0x20] sm:$0xff]  ;;  %v408_v50 = vadd.f32 %v402_v11, %v399_v42  ;;  %v441_v51 = vrot.slane %v433_v43, 7  ;;  %v1273_v30 = vld [vmem:[%s1600_s3 + $0x10] sm:$0xff]  }
 0x105   : > { %v580_v52 = vpack.c.bf16 %v1393_v49, %v532_v45  ;;  %423 = vst.msk [vmem:[#allocation2 + $0x40] sm:$0xff] %vm411_vm1, %v410_v46  ;;  %v434_v53 = vld [vmem:[#allocation2 + $0x10] sm:$0xff]  ;;  %v541_v56 = vrot.slane %v1393_v49, 7  ;;  %v607_v61 = vrot.slane %v1393_v49, 1  ;;  %v548_v0 = vsel %vm426_vm3, %v540_v55, 0.0  ;;  %1221 = vmatprep.subr.bf16.mxu1 %v1273_v30 }
 0x106   : > { %472 = vrot.lane.b32.xlu0 %v464_v47, %s1300_s19  ;;  %421 = vst.msk [vmem:[#allocation2 + $0x30] sm:$0xff] %vm411_vm1, %v408_v50  ;;  %v442_v57 = vrot.slane %v434_v53, 7  ;;  %v498_v58 = vsel %vm429_vm2, %v490_v48, 0.0  ;;  %v465_v60 = vpack.c.bf16 %v532_v45, %v434_v53  ;;  %v449_v63 = vsel %vm426_vm3, %v441_v51, 0.0  ;;  %1222 = vmatpush3.bf16.msra.mxu1 %v1273_v30  ;;  %v653_v45 = vld [vmem:[#allocation2 + $0x48] sm:$0xff] }
 0x107   : > { %589 = vrot.lane.b32.xlu1 %v580_v52, %s1301_s20  ;;  %v505_v62 = vpack.c.bf16 %v498_v58, %v497_v54  ;;  %v549_v1 = vsel %vm426_vm3, %v541_v56, 0.0  ;;  %v456_v2 = vpack.c.bf16 %v449_v63, %v448_v59  ;;  %v579_v6 = vpack.c.bf16 %v434_v53, %v433_v43  ;;  %1223 = vmatprep.subr.bf16.mxu1 %v1274_v34 }
 0x108   : > { %v450_v3 = vsel %vm426_vm3, %v442_v57, 0.0  ;;  %v555_v7 = vpack.c.bf16 %v549_v1, %v548_v0  ;;  %v1424_v8 = vsel %vm429_vm2, %v607_v61, 0.0  ;;  %v491_v9 = vrot.slane %v434_v53, 1 }
 0x109   : > { %v457_v4 = vpack.c.bf16 %v548_v0, %v450_v3  ;;  %460 = vst.msk [vmem:[#allocation3] sm:$0xff] %vm411_vm1, %v456_v2  ;;  %v614_v13 = vsel %vm429_vm2, %v606_v5, 0.0  ;;  %v554_v19 = vpack.c.bf16 %v450_v3, %v449_v63  ;;  %v817_v40 = vsel %vm815_vm4, %v1275_v38, 0 }
 0x10a   : > { %474 = vrot.lane.b32.xlu0 %v465_v60, %s1300_s19  ;;  %v1427_v11 = vld [vmem:[#allocation2 + $0x38] sm:$0xff]  ;;  %v621_v14 = vpack.c.bf16 %v1424_v8, %v614_v13  ;;  %v499_v16 = vsel %vm429_vm2, %v491_v9, 0.0  ;;  %1224 = vmatpush3.bf16.msra.mxu1 %v1274_v34  ;;  %v661_v50 = vrot.slane %v653_v45, 7  ;;  %v727_v59 = vrot.slane %v653_v45, 1 }
 0x10b   : > { %513 = vrot.lane.b32.xlu1 %v505_v62, %s1302_s21  ;;  %461 = vst.msk [vmem:[#allocation3 + $0x8] sm:$0xff] %vm411_vm1, %v457_v4  ;;  %v649_v10 = vld [vmem:[#allocation2 + $0x28] sm:$0xff]  ;;  %v447_v18 = vrot.slane %v1427_v11, 7  ;;  %v506_v20 = vpack.c.bf16 %v614_v13, %v499_v16  ;;  %v620_v27 = vpack.c.bf16 %v499_v16, %v498_v58  ;;  %1245 = vmatprep.subr.msk.bf16.mxu1 %vm815_vm4, %v1275_v38  ;;  %v610_v43 = vrot.slane %v1427_v11, 1 }
 0x10c   : > { %v445_v15 = vrot.slane %v649_v10, 7  ;;  %v696_v29 = vpack.c.bf16 %v649_v10, %v1393_v49  ;;  %v537_v31 = vld [vmem:[#allocation2 + $0x40] sm:$0xff]  ;;  %v723_v37 = vrot.slane %v649_v10, 1  ;;  %v669_v53 = vsel %vm426_vm3, %v661_v50, 0.0 }
 0x10d   : > { %v1429_v12 = vld [vmem:[#allocation2 + $0x30] sm:$0xff]  ;;  %v455_v25 = vsel %vm426_vm3, %v447_v18, 0.0  ;;  %v582_v33 = vpack.c.bf16 %v537_v31, %v1427_v11  ;;  %v545_v39 = vrot.slane %v537_v31, 7  ;;  %v611_v44 = vrot.slane %v537_v31, 1 }
 0x10e   : > { %587 = vrot.lane.b32.xlu0 %v579_v6, %s1301_s20  ;;  %v446_v17 = vrot.slane %v1429_v12, 7  ;;  %v1442_v21 = vsel %vm426_vm3, %v445_v15, 0.0  ;;  %v581_v35 = vpack.c.bf16 %v1429_v12, %v649_v10  ;;  %v467_v36 = vpack.c.bf16 %v1427_v11, %v1429_v12  ;;  %1226 = vmatpush3.bf16.msra.mxu1 %v817_v40 }
 0x10f   : > { %564 = vrot.lane.b32.xlu1 %v555_v7, %s1303_s22  ;;  %v458_v23 = vpack.c.bf16 %v1442_v21, %v549_v1  ;;  %v731_v41 = vsel %vm429_vm2, %v723_v37, 0.0  ;;  %v553_v42 = vsel %vm426_vm3, %v545_v39, 0.0  ;;  %v618_v48 = vsel %vm429_vm2, %v610_v43, 0.0 }
 0x110   : > { %v454_v24 = vsel %vm426_vm3, %v446_v17, 0.0  ;;  %v737_v46 = vpack.c.bf16 %v731_v41, %v1424_v8  ;;  %v557_v47 = vpack.c.bf16 %v553_v42, %v455_v25  ;;  %v619_v49 = vsel %vm429_vm2, %v611_v44, 0.0 }
 0x111   : > { %v1454_v26 = vpack.c.bf16 %v455_v25, %v454_v24  ;;  %462 = vst.msk [vmem:[#allocation3 + $0x10] sm:$0xff] %vm411_vm1, %v458_v23  ;;  %v623_v51 = vpack.c.bf16 %v619_v49, %v618_v48  ;;  %v609_v52 = vrot.slane %v1429_v12, 1  ;;  %v556_v54 = vpack.c.bf16 %v454_v24, %v1442_v21 }
 0x112   : > { %703 = vrot.lane.b32.xlu0 %v465_v60, %s1304_s23  ;;  %v673_v55 = vpack.c.bf16 %v669_v53, %v553_v42  ;;  %v698_v60 = vpack.c.bf16 %v653_v45, %v537_v31  ;;  %v735_v61 = vsel %vm429_vm2, %v727_v59, 0.0 }
 0x113   : > { %630 = vrot.lane.b32.xlu1 %v621_v14, %s1305_s24  ;;  %463 = vst.msk [vmem:[#allocation3 + $0x18] sm:$0xff] %vm411_vm1, %v1454_v26  ;;  %v617_v56 = vsel %vm429_vm2, %v609_v52, 0.0  ;;  %v739_v62 = vpack.c.bf16 %v735_v61, %v619_v49 }
 0x114   : > { %v622_v57 = vpack.c.bf16 %v617_v56, %v731_v41  ;;  %v508_v58 = vpack.c.bf16 %v618_v48, %v617_v56 }
 0x116   : > { %562 = vrot.lane.b32.xlu0 %v554_v19, %s1303_s22 }
 0x117   : > { %515 = vrot.lane.b32.xlu1 %v506_v20, %s1302_s21 }
 0x11a   : > { %628 = vrot.lane.b32.xlu0 %v620_v27, %s1305_s24 }
 0x11b   : > { %705 = vrot.lane.b32.xlu1 %v696_v29, %s1304_s23 }
 0x11e   : > { %678 = vrot.lane.b32.xlu0 %v457_v4, %s1306_s8 }
 0x11f   : > { %476 = vrot.lane.b32.xlu1 %v696_v29, %s1300_s19 }
 0x122   : > { %744 = vrot.lane.b32.xlu0 %v506_v20, %s1307_s13 }
 0x123   : > { %593 = vrot.lane.b32.xlu1 %v582_v33, %s1301_s20 }
 0x126   : > { %591 = vrot.lane.b32.xlu0 %v581_v35, %s1301_s20  ;;  %v896_v35 = vld [vmem:[%s1601_s4] sm:$0xf] }
 0x127   : > { %478 = vrot.lane.b32.xlu1 %v467_v36, %s1300_s19  ;;  %1246 = vmatprep.subr.msk.bf16.mxu0 %vm815_vm4, %v896_v35  ;;  %s1122_s19 = sld [smem:[#allocation5 + $0x1]] }
 0x12a   : > { %707 = vrot.lane.b32.xlu0 %v467_v36, %s1304_s23  ;;  %v933_v36 = vsel %vm815_vm4, %v896_v35, 0 }
 0x12b   : > { %680 = vrot.lane.b32.xlu1 %v458_v23, %s1306_s8  ;;  %1236 = vmatpush3.bf16.msra.mxu0 %v933_v36 }
 0x12d   : > { %v774_v37 = vstv %s1122_s19 }
 0x12e   : > { %746 = vrot.lane.b32.xlu0 %v737_v46, %s1307_s13 }
 0x12f   : > { %568 = vrot.lane.b32.xlu1 %v557_v47, %s1303_s22 }
 0x132   : > { %517 = vrot.lane.b32.xlu0 %v737_v46, %s1302_s21 }
 0x133   : > { %634 = vrot.lane.b32.xlu1 %v623_v51, %s1305_s24 }
 0x136   : > { %566 = vrot.lane.b32.xlu0 %v556_v54, %s1303_s22 }
 0x137   : > { %684 = vrot.lane.b32.xlu1 %v673_v55, %s1306_s8 }
 0x13a   : > { %632 = vrot.lane.b32.xlu0 %v622_v57, %s1305_s24  ;;  %s1574_s24 = scalar_lea.vmem %s1604_s7, %s1119_s12 }
 0x13b   : > { %519 = vrot.lane.b32.xlu1 %v508_v58, %s1302_s21 }
 0x13e   : > { %682 = vrot.lane.b32.xlu0 %v1454_v26, %s1306_s8 }
 0x13f   : > { %709 = vrot.lane.b32.xlu1 %v698_v60, %s1304_s23 }
 0x142   : > { %748 = vrot.lane.b32.xlu0 %v508_v58, %s1307_s13 }
 0x143   : > { %750 = vrot.lane.b32.xlu1 %v739_v62, %s1307_s13 }
 0x178   : > { %v473_v63 = vpop.permute.xlu0 %472 }
 0x179   : > { %485 = vst.msk [vmem:[#allocation3] sm:$0xff] %vm484_vm5, %v473_v63  ;;  %v590_v0 = vpop.permute.xlu1 %589 }
 0x17c   : > { %v475_v1 = vpop.permute.xlu0 %474 }
 0x17d   : > { %486 = vst.msk [vmem:[#allocation3 + $0x8] sm:$0xff] %vm484_vm5, %v475_v1  ;;  %v514_v2 = vpop.permute.xlu1 %513 }
 0x17e   : > { %526 = vst.msk [vmem:[#allocation3] sm:$0xff] %vm525_vm6, %v514_v2  ;;  %v1182_v2 = vld [vmem:[%s1373_s15 + $0x8] sm:$0xff]  }
 0x180   : > { %v588_v32 = vpop.permute.xlu0 %587 }
 0x181   : > { %v565_v3 = vpop.permute.xlu1 %564 }
 0x184   : > { %v704_v4 = vpop.permute.xlu0 %703 }
 0x185   : > { %v631_v5 = vpop.permute.xlu1 %630 }
 0x188   : > { %v563_v6 = vpop.permute.xlu0 %562 }
 0x189   : > { %575 = vst.msk [vmem:[#allocation3] sm:$0xff] %vm574_vm7, %v563_v6  ;;  %v516_v7 = vpop.permute.xlu1 %515 }
 0x18a   : > { %527 = vst.msk [vmem:[#allocation3 + $0x8] sm:$0xff] %vm525_vm6, %v516_v7 }
 0x18b   : > { %600 = vst.msk [vmem:[#allocation3] sm:$0xff] %vm599_vm8, %v588_v32  ;;  %v1167_v32 = vld [vmem:[%s1373_s15] sm:$0xff]  }
 0x18c   : > { %576 = vst.msk [vmem:[#allocation3 + $0x8] sm:$0xff] %vm574_vm7, %v565_v3  ;;  %v629_v8 = vpop.permute.xlu0 %628  ;;  %v1143_v3 = vld [vmem:[%s1603_s6] ss:$0 sm:$0xff]  ;;  %v1168_v6 = vunpack.c.l.bf16 %v1167_v32 }
 0x18d   : > { %601 = vst.msk [vmem:[#allocation3 + $0x8] sm:$0xff] %vm599_vm8, %v590_v0  ;;  %v706_v9 = vpop.permute.xlu1 %705 }
 0x18e   : > { %641 = vst.msk [vmem:[#allocation3] sm:$0xff] %vm640_vm9, %v629_v8  ;;  %642 = vst.msk [vmem:[#allocation3 + $0x8] sm:$0xff] %vm640_vm9, %v631_v5 }
 0x190   : > { %v679_v10 = vpop.permute.xlu0 %678 }
 0x191   : > { %691 = vst.msk [vmem:[#allocation3] sm:$0xff] %vm690_vm10, %v679_v10  ;;  %v477_v11 = vpop.permute.xlu1 %476 }
 0x192   : > { %487 = vst.msk [vmem:[#allocation3 + $0x10] sm:$0xff] %vm484_vm5, %v477_v11 }
 0x193   : > { %716 = vst.msk [vmem:[#allocation3] sm:$0xff] %vm715_vm11, %v704_v4  ;;  %v1172_v4 = vunpack.c.l.bf16 %v1182_v2 }
 0x194   : > { %v745_v12 = vpop.permute.xlu0 %744 }
 0x195   : > { %757 = vst.msk [vmem:[#allocation3] sm:$0xff] %vm756_vm12, %v745_v12  ;;  %v594_v13 = vpop.permute.xlu1 %593  ;;  %v1169_v12 = vunpack.c.h.bf16 %v1167_v32 }
 0x198   : > { %v592_v14 = vpop.permute.xlu0 %591 }
 0x199   : > { %v479_v15 = vpop.permute.xlu1 %478 }
 0x19a   : > { %488 = vst.msk [vmem:[#allocation3 + $0x18] sm:$0xff] %vm484_vm5, %v479_v15 }
 0x19c   : > { %v708_v16 = vpop.permute.xlu0 %707  ;;  %v761_v17 = vld [vmem:[#allocation3] sm:$0xff] }
 0x19d   : > { %v681_v18 = vpop.permute.xlu1 %680  ;;  %1227 = vmatprep.mubr.msk.bf16.mxu1 %vm802_vm13, %v761_v17 }
 0x19e   : > { %692 = vst.msk [vmem:[#allocation3 + $0x8] sm:$0xff] %vm690_vm10, %v681_v18 }
 0x19f   : > { %717 = vst.msk [vmem:[#allocation3 + $0x8] sm:$0xff] %vm715_vm11, %v706_v9  ;;  %v1173_v9 = vunpack.c.h.bf16 %v1182_v2 }
 0x1a0   : > { %v747_v19 = vpop.permute.xlu0 %746 }
 0x1a1   : > { %758 = vst.msk [vmem:[#allocation3 + $0x8] sm:$0xff] %vm756_vm12, %v747_v19  ;;  %v569_v20 = vpop.permute.xlu1 %568 }
 0x1a4   : > { %v518_v21 = vpop.permute.xlu0 %517 }
 0x1a5   : > { %528 = vst.msk [vmem:[#allocation3 + $0x10] sm:$0xff] %vm525_vm6, %v518_v21  ;;  %v635_v22 = vpop.permute.xlu1 %634 }
 0x1a8   : > { %v567_v23 = vpop.permute.xlu0 %566  ;;  %v762_v24 = vld [vmem:[#allocation3 + $0x8] sm:$0xff] }
 0x1a9   : > { %577 = vst.msk [vmem:[#allocation3 + $0x10] sm:$0xff] %vm574_vm7, %v567_v23  ;;  %v685_v25 = vpop.permute.xlu1 %684  ;;  %1228 = vmatmul.mubr.msk.bf16.vlgmr.msra.gmra.mrb[0].mxu1 %vm802_vm13, %v762_v24 }
 0x1aa   : > { %602 = vst.msk [vmem:[#allocation3 + $0x10] sm:$0xff] %vm599_vm8, %v592_v14 }
 0x1ac   : > { %v633_v26 = vpop.permute.xlu0 %632 }
 0x1ad   : > { %643 = vst.msk [vmem:[#allocation3 + $0x10] sm:$0xff] %vm640_vm9, %v633_v26  ;;  %v520_v27 = vpop.permute.xlu1 %519 }
 0x1ae   : > { %529 = vst.msk [vmem:[#allocation3 + $0x18] sm:$0xff] %vm525_vm6, %v520_v27 }
 0x1af   : > { %578 = vst.msk [vmem:[#allocation3 + $0x18] sm:$0xff] %vm574_vm7, %v569_v20 }
 0x1b0   : > { %603 = vst.msk [vmem:[#allocation3 + $0x18] sm:$0xff] %vm599_vm8, %v594_v13  ;;  %v683_v28 = vpop.permute.xlu0 %682 }
 0x1b1   : > { %644 = vst.msk [vmem:[#allocation3 + $0x18] sm:$0xff] %vm640_vm9, %v635_v22  ;;  %v710_v29 = vpop.permute.xlu1 %709 }
 0x1b2   : > { %693 = vst.msk [vmem:[#allocation3 + $0x10] sm:$0xff] %vm690_vm10, %v683_v28  ;;  %694 = vst.msk [vmem:[#allocation3 + $0x18] sm:$0xff] %vm690_vm10, %v685_v25  ;;  %v1184_v28 = vld [vmem:[%s1373_s15 + $0x18] sm:$0xff]  }
 0x1b3   : > { %718 = vst.msk [vmem:[#allocation3 + $0x10] sm:$0xff] %vm715_vm11, %v708_v16  ;;  %719 = vst.msk [vmem:[#allocation3 + $0x18] sm:$0xff] %vm715_vm11, %v710_v29  ;;  %v1183_v29 = vld [vmem:[%s1373_s15 + $0x10] sm:$0xff]   ;;  %v1181_v36 = vunpack.c.h.bf16 %v1184_v28 }
 0x1b4   : > { %v749_v30 = vpop.permute.xlu0 %748 }
 0x1b5   : > { %759 = vst.msk [vmem:[#allocation3 + $0x10] sm:$0xff] %vm756_vm12, %v749_v30  ;;  %v751_v31 = vpop.permute.xlu1 %750  ;;  %v1180_v30 = vunpack.c.l.bf16 %v1184_v28 }
 0x1b6   : > { %760 = vst.msk [vmem:[#allocation3 + $0x18] sm:$0xff] %vm756_vm12, %v751_v31 }
 0x1bc   : > { %v763_v33 = vld [vmem:[#allocation3 + $0x10] sm:$0xff] }
 0x1bd   : > { %1231 = vmatprep.mubr.msk.bf16.mxu1 %vm802_vm13, %v763_v33  ;;  %v764_v34 = vld [vmem:[#allocation3 + $0x18] sm:$0xff]  ;;  %v1176_v33 = vunpack.c.l.bf16 %v1183_v29 }
 0x1be   : > { %1232 = vmatmul.mubr.msk.bf16.gmra.mrb[4].mxu1 %vm802_vm13, %v764_v34 }
 0x27c   : > { %v1229_v38 = vpop.f32.mrb[0].mxu1 }
 0x27d   : > { %v862_v39 = vadd.f32 %v1229_v38, %v774_v37  ;;  %v853_v40 = vpop.f32.mrb[1].mxu1 }
 0x27e   : > { %v854_v41 = vadd.f32 %v853_v40, %v774_v37  ;;  %v1230_v42 = vpop.f32.mrb[2].mxu1 }
 0x27f   : > { %v865_v43 = vadd.f32 %v1230_v42, %v774_v37  ;;  %v856_v44 = vpop.f32.mrb[3].mxu1  ;;  %v886_v46 = vmax.f32 %v862_v39, 0.0  ;;  %v1177_v39 = vunpack.c.h.bf16 %v1183_v29 }
 0x280   : > { %v857_v45 = vadd.f32 %v856_v44, %v774_v37  ;;  %v884_v48 = vmax.f32 %v854_v41, 0.0 }
 0x281   : > { %v887_v47 = vmax.f32 %v865_v43, 0.0 }
 0x282   : > { %v885_v49 = vmax.f32 %v857_v45, 0.0 }
 0x283   : > { %v893_v50 = vpack.c.bf16 %v887_v47, %v886_v46 }
 0x284   : > { %v892_v51 = vpack.c.bf16 %v885_v49, %v884_v48 }
 0x286   : > { %1237 = vmatprep.mubr.msk.bf16.mxu0 %vm411_vm1, %v892_v51 }
 0x287   : > { %1238 = vmatmul.mubr.msk.bf16.vlgmr.msra.gmra.mrb[8].mxu0 %vm411_vm1, %v893_v50 }
 0x291   : > { %v1233_v52 = vpop.f32.mrb[4].mxu1 }
 0x292   : > { %v878_v53 = vadd.f32 %v1233_v52, %v774_v37  ;;  %v869_v54 = vpop.f32.mrb[5].mxu1 }
 0x293   : > { %v870_v55 = vadd.f32 %v869_v54, %v774_v37  ;;  %v1234_v56 = vpop.f32.mrb[6].mxu1 }
 0x294   : > { %v881_v57 = vadd.f32 %v1234_v56, %v774_v37  ;;  %v872_v58 = vpop.f32.mrb[7].mxu1  ;;  %v890_v60 = vmax.f32 %v878_v53, 0.0 }
 0x295   : > { %v873_v59 = vadd.f32 %v872_v58, %v774_v37  ;;  %v888_v62 = vmax.f32 %v870_v55, 0.0 }
 0x296   : > { %v891_v61 = vmax.f32 %v881_v57, 0.0 }
 0x297   : > { %v889_v63 = vmax.f32 %v873_v59, 0.0 }
 0x298   : > { %v895_v0 = vpack.c.bf16 %v891_v61, %v890_v60 }
 0x299   : > { %v894_v1 = vpack.c.bf16 %v889_v63, %v888_v62 }
 0x29b   : > { %1241 = vmatprep.mubr.msk.bf16.mxu0 %vm411_vm1, %v894_v1 }
 0x29c   : > { %1242 = vmatmul.mubr.msk.bf16.gmra.mrb[12].mxu0 %vm411_vm1, %v895_v0 }
 0x35a   : > { %v1239_v5 = vpop.f32.mrb[8].mxu0 }
 0x35b   : > { %v978_v7 = vadd.f32 %v1239_v5, %v1143_v3  ;;  %v969_v8 = vpop.f32.mrb[9].mxu0 }
 0x35c   : > { %v970_v10 = vadd.f32 %v1143_v3, %v969_v8  ;;  %v1240_v11 = vpop.f32.mrb[10].mxu0 }
 0x35d   : > { %v1002_v13 = vadd.f32 %v1172_v4, %v978_v7  ;;  %v981_v14 = vadd.f32 %v1240_v11, %v1143_v3  ;;  %v972_v15 = vpop.f32.mrb[11].mxu0 }
 0x35e   : > { %v1000_v16 = vadd.f32 %v1168_v6, %v970_v10  ;;  %v973_v17 = vadd.f32 %v1143_v3, %v972_v15 }
 0x35f   : > { %v1010_v18 = vmax.f32 %v1002_v13, 0.0  ;;  %v1003_v19 = vadd.f32 %v1173_v9, %v981_v14 }
 0x360   : > { %v1008_v20 = vmax.f32 %v1000_v16, 0.0  ;;  %v1001_v21 = vadd.f32 %v1169_v12, %v973_v17 }
 0x361   : > { %v1160_v22 = vpack.c.bf16 %v1010_v18, %v1010_v18  ;;  %v1011_v23 = vmax.f32 %v1003_v19, 0.0 }
 0x362   : > { %v1158_v24 = vpack.c.bf16 %v1008_v20, %v1008_v20  ;;  %v1009_v25 = vmax.f32 %v1001_v21, 0.0 }
 0x363   : > { %1051 = vst.msk [vmem:[%s1574_s24 + $0x8] sm:$0xf] %vm1048_vm14, %v1160_v22  ;;  %v1161_v26 = vpack.c.bf16 %v1011_v23, %v1011_v23 }
 0x364   : > { %1049 = vst.msk [vmem:[%s1574_s24] sm:$0xf] %vm1048_vm14, %v1158_v24  ;;  %v1159_v27 = vpack.c.bf16 %v1009_v25, %v1009_v25 }
 0x365   : > { %1052 = vst.msk [vmem:[%s1574_s24 + $0xc] sm:$0xf] %vm1048_vm14, %v1161_v26 }
 0x366   : > { %1050 = vst.msk [vmem:[%s1574_s24 + $0x4] sm:$0xf] %vm1048_vm14, %v1159_v27 }
 0x36f   : > { %v1243_v31 = vpop.f32.mrb[12].mxu0 }
 0x370   : > { %v994_v34 = vadd.f32 %v1243_v31, %v1143_v3  ;;  %v985_v35 = vpop.f32.mrb[13].mxu0 }
 0x371   : > { %v986_v37 = vadd.f32 %v1143_v3, %v985_v35  ;;  %v1244_v38 = vpop.f32.mrb[14].mxu0 }
 0x372   : > { %v1006_v40 = vadd.f32 %v1180_v30, %v994_v34  ;;  %v997_v41 = vadd.f32 %v1244_v38, %v1143_v3  ;;  %v988_v42 = vpop.f32.mrb[15].mxu0 }
 0x373   : > { %v1004_v43 = vadd.f32 %v1176_v33, %v986_v37  ;;  %v989_v44 = vadd.f32 %v1143_v3, %v988_v42 }
 0x374   : > { %v1014_v45 = vmax.f32 %v1006_v40, 0.0  ;;  %v1007_v46 = vadd.f32 %v1181_v36, %v997_v41 }
 0x375   : > { %v1012_v47 = vmax.f32 %v1004_v43, 0.0  ;;  %v1005_v48 = vadd.f32 %v1177_v39, %v989_v44 }
 0x376   : > { %v1164_v49 = vpack.c.bf16 %v1014_v45, %v1014_v45  ;;  %v1015_v50 = vmax.f32 %v1007_v46, 0.0 }
 0x377   : > { %v1162_v51 = vpack.c.bf16 %v1012_v47, %v1012_v47  ;;  %v1013_v52 = vmax.f32 %v1005_v48, 0.0 }
 0x378   : > { %1055 = vst.msk [vmem:[%s1574_s24 + $0x18] sm:$0xf] %vm1048_vm14, %v1164_v49  ;;  %v1165_v53 = vpack.c.bf16 %v1015_v50, %v1015_v50 }
 0x379   : > { %1053 = vst.msk [vmem:[%s1574_s24 + $0x10] sm:$0xf] %vm1048_vm14, %v1162_v51  ;;  %v1163_v54 = vpack.c.bf16 %v1013_v52, %v1013_v52 }
 0x37a   : > { %1056 = vst.msk [vmem:[%s1574_s24 + $0x1c] sm:$0xf] %vm1048_vm14, %v1165_v53 }
 0x37b   : > { %1054 = vst.msk [vmem:[%s1574_s24 + $0x14] sm:$0xf] %vm1048_vm14, %v1163_v54 }
 0x37c PF: > { %s23_s29 = sadd.s32 1, %s1296_s29  }
 0x37d   : > { %p20_p9 = scmp.ge.s32.totalorder %s23_s29, 4  }
 0x37f   :  { %22 = sbr.rel (!%p20_p9) target bundleno = 16 (0x10), region = 77 }

</bundles_post_ra>
